<compile_context>
chip_gen: v5e
topology: v5e:2x2
jax: 0.10.0
libtpu: 0.0.40
codegen_flags: <defaults>
</compile_context>

<pallas_src>
import functools

import jax
import jax.numpy as jnp
from jax.experimental import pallas as pl
from jax.experimental.pallas import tpu as pltpu

_LANE = 128           # TPU lane width; class dim padded to a multiple of this
_SUBLANE = 8
_NEG_INF = -1e30      # finite "-inf" used to mask padded softmax lanes


# ---------------------------------------------------------------------------
# Kernel
# ---------------------------------------------------------------------------
def _seq_forward_kernel(x_ref, w_ref, b_ref, out_ref, *, D, H1, H2, Cp):
    """Fused forward: Linear -> Rect -> Linear -> Rect -> Linear -> SoftMax.

    Matmuls run on the MXU in bf16 with f32 accumulation; bias-add / ReLU /
    softmax run in f32 on the VPU/EUP.  The three weight matrices live in one
    packed bf16 slab `w_ref` (rows D + H1 + H2), the three bias rows in `b_ref`.
    Padded class lanes carry a -1e30 bias so they contribute exp(-inf) == 0 to
    the softmax denominator.
    """
    x = x_ref[...]  # bf16 tile

    # Linear 1 + Rect
    w1 = w_ref[0:D, 0:H1]
    b1 = b_ref[0:1, 0:H1]
    h1 = jnp.dot(x, w1, preferred_element_type=jnp.float32) + b1
    h1 = jnp.maximum(h1, 0.0).astype(jnp.bfloat16)

    # Linear 2 + Rect
    w2 = w_ref[D:D + H1, 0:H2]
    b2 = b_ref[1:2, 0:H2]
    h2 = jnp.dot(h1, w2, preferred_element_type=jnp.float32) + b2
    h2 = jnp.maximum(h2, 0.0).astype(jnp.bfloat16)

    # Linear 3 (logits; padded lanes get -1e30 from the padded bias row)
    w3 = w_ref[D + H1:D + H1 + H2, 0:Cp]
    b3 = b_ref[2:3, 0:Cp]
    logits = jnp.dot(h2, w3, preferred_element_type=jnp.float32) + b3

    # SoftMax (max-shifted for stability; padded lanes exp to exactly 0).
    # Exact f32 divide so probability rows sum to 1 to f32 precision.
    m = jnp.max(logits, axis=-1, keepdims=True)
    e = jnp.exp(logits - m)
    denom = jnp.sum(e, axis=-1, keepdims=True)
    out_ref[...] = (e / denom).astype(out_ref.dtype)


# ---------------------------------------------------------------------------
# One-time parameter preparation (hoisted out of the per-call hot path)
# ---------------------------------------------------------------------------
def prepare_params(w1, b1, w2, b2, w3, b3):
    """Pack weights/biases into lane-dense slabs once (cast + pad + concat).

    Returns (w_slab, b_slab, dims) where
      w_slab : (D+H1+H2, max(H1,H2,Cp)) bf16, W1/W2/W3 stacked row-wise
      b_slab : (3, max(H1,H2,Cp)) f32, rows = b1 / b2 / b3(-1e30-padded)
      dims   : static tuple (D, H1, H2, C, Cp)
    """
    D, H1 = w1.shape
    _, H2 = w2.shape
    _, C = w3.shape
    Cp = max(_LANE, pl.cdiv(C, _LANE) * _LANE)
    Wmax = max(H1, H2, Cp)
    R = D + H1 + H2

    w_slab = jnp.zeros((R, Wmax), jnp.bfloat16)
    w_slab = w_slab.at[0:D, 0:H1].set(w1.astype(jnp.bfloat16))
    w_slab = w_slab.at[D:D + H1, 0:H2].set(w2.astype(jnp.bfloat16))
    w_slab = w_slab.at[D + H1:R, 0:C].set(w3.astype(jnp.bfloat16))

    b3_row = jnp.full((Cp,), _NEG_INF, jnp.float32).at[0:C].set(
        b3.reshape(-1).astype(jnp.float32))
    b_slab = jnp.zeros((3, Wmax), jnp.float32)
    b_slab = b_slab.at[0, 0:H1].set(b1.reshape(-1).astype(jnp.float32))
    b_slab = b_slab.at[1, 0:H2].set(b2.reshape(-1).astype(jnp.float32))
    b_slab = b_slab.at[2, 0:Cp].set(b3_row)

    dims = (int(D), int(H1), int(H2), int(C), int(Cp))
    return w_slab, b_slab, dims


def _num_tensorcores():
    """Best-effort TensorCore count of the local device (v7x has 2 per chip)."""
    try:
        kind = (getattr(jax.devices()[0], "device_kind", "") or "").lower()
        if "v7" in kind:
            return 2
        return 1
    except Exception:  # noqa: BLE001
        return 1


# ---------------------------------------------------------------------------
# Jitted forward (single dispatch: cast x -> pallas kernel -> unpad slice)
# ---------------------------------------------------------------------------
@functools.partial(jax.jit, static_argnames=("dims", "block_n"))
def _forward_jit(x, w_slab, b_slab, *, dims, block_n):
    D, H1, H2, C, Cp = dims
    N = x.shape[0]
    R, Wmax = w_slab.shape
    grid = (N // block_n,)

    # VMEM budget with headroom: double-buffered x/out tiles + weight/bias slabs
    # + f32 intermediates.  Tiny at these sizes; clamp well under the smallest
    # scoped default (v7x: 32 MiB scoped / 64 MiB physical).
    bytes_needed = (
        2 * block_n * D * 2            # bf16 x tile (x2 buffers)
        + 2 * block_n * Cp * 4         # f32 out tile (x2 buffers)
        + 2 * R * Wmax * 2             # bf16 weight slab
        + 2 * 3 * Wmax * 4             # f32 bias slab
        + block_n * (H1 + H2 + Cp) * 4 # f32 h1/h2/logits
    )
    vmem_limit = int(min(max(4 * bytes_needed, 8 << 20), 32 << 20))

    cost = pl.CostEstimate(
        flops=2 * N * (D * H1 + H1 * H2 + H2 * Cp),
        transcendentals=N * Cp,
        bytes_accessed=N * D * 2 + R * Wmax * 2 + 3 * Wmax * 4 + N * Cp * 4,
    )

    # TODO(synk): for hidden sizes where the packed weight slab no longer fits
    # VMEM (threshold derived from pltpu.get_tpu_info().vmem_capacity_bytes;
    # roughly half as large on v7x as on v5e/v6e), split the contraction dims
    # over a trailing "arbitrary" grid axis with an f32 VMEM accumulator
    # instead of keeping all weights resident.
    out_p = pl.pallas_call(
        functools.partial(_seq_forward_kernel, D=D, H1=H1, H2=H2, Cp=Cp),
        out_shape=jax.ShapeDtypeStruct((N, Cp), jnp.float32),
        grid=grid,
        in_specs=[
            pl.BlockSpec((block_n, D), lambda i: (i, 0)),  # X tile over batch
            pl.BlockSpec((R, Wmax), lambda i: (0, 0)),     # packed weights (resident)
            pl.BlockSpec((3, Wmax), lambda i: (0, 0)),     # packed biases (resident)
        ],
        out_specs=pl.BlockSpec((block_n, Cp), lambda i: (i, 0)),
        compiler_params=pltpu.CompilerParams(
            dimension_semantics=("parallel",),
            vmem_limit_bytes=vmem_limit,
        ),
        cost_estimate=cost,
    )(x.astype(jnp.bfloat16), w_slab, b_slab)

    # Un-pad class lanes inside the same jitted program (no extra dispatch).
    return out_p[:, :C]


def sequential_forward(x, params, *, block_n=None):
    """Forward pass of Sequential([Linear, Rect, Linear, Rect, Linear, SoftMax]).

    `params` comes from `prepare_params` (one-time cast/pad/pack).  Returns f32
    probabilities of shape (N, C).
    """
    w_slab, b_slab, dims = params
    N = x.shape[0]
    if block_n is None:
        ncores = _num_tensorcores()
        block_n = N if ncores <= 1 else max(_SUBLANE, N // ncores)
    block_n = int(block_n)
    if N % block_n != 0 or block_n % _SUBLANE != 0:
        block_n = N  # fall back to one full-batch tile (always legal)
    return _forward_jit(x, w_slab, b_slab, dims=dims, block_n=block_n)


# ---------------------------------------------------------------------------
# Reference + self-test
# ---------------------------------------------------------------------------
def _reference_forward(x, w1, b1, w2, b2, w3, b3):
    h1 = jnp.maximum(x @ w1 + b1, 0.0)
    h2 = jnp.maximum(h1 @ w2 + b2, 0.0)
    logits = h2 @ w3 + b3
    e = jnp.exp(logits - jnp.max(logits, axis=-1, keepdims=True))
    return e / jnp.sum(e, axis=-1, keepdims=True)


if __name__ == "__main__":
    # Representative LRP-toolbox dense net; dims multiples of (8, 128) so the
    # packed-slab slices are tile-aligned, batch tiles cleanly for 1 or 2 TCs.
    N, D, H1, H2, C = 256, 128, 256, 128, 10

    key = jax.random.PRNGKey(0)
    kx, k1, k2, k3 = jax.random.split(key, 4)

    x = jax.random.normal(kx, (N, D), dtype=jnp.float32)
    # Deterministic "LRP toolbox style" init: W ~ N(0,1)/sqrt(fan_in), b = 0.
    w1 = jax.random.normal(k1, (D, H1), dtype=jnp.float32) / jnp.sqrt(D)
    b1 = jnp.zeros((1, H1), dtype=jnp.float32)
    w2 = jax.random.normal(k2, (H1, H2), dtype=jnp.float32) / jnp.sqrt(H1)
    b2 = jnp.zeros((1, H2), dtype=jnp.float32)
    w3 = jax.random.normal(k3, (H2, C), dtype=jnp.float32) / jnp.sqrt(H2)
    b3 = jnp.zeros((1, C), dtype=jnp.float32)

    # One-time weight prep (cached across forward calls in real use).
    params = jax.block_until_ready(prepare_params(w1, b1, w2, b2, w3, b3))

    out = sequential_forward(x, params)
    out = jax.block_until_ready(out)

    ref = _reference_forward(x, w1, b1, w2, b2, w3, b3)
    assert out.shape == (N, C)
    # bf16 matmuls (f32 accumulation) -> relaxed tolerance on probabilities.
    assert float(jnp.max(jnp.abs(out - ref))) < 5e-2, "mismatch vs reference"
    # Exact f32 divide in the kernel -> rows sum to 1 to f32 precision.
    assert float(jnp.max(jnp.abs(jnp.sum(out, axis=-1) - 1.0))) < 1e-3, \
        "softmax rows must sum to 1"

    # TODO(synk): Sequential.train / backward / update / lrp / clean are
    # host-side training and relevance-propagation loops; only the forward
    # chain is kernelized.
    print("KERNEL_OK")
</pallas_src>

<mosaic_0001>
module attributes {stable_mosaic.version = 11 : i64} {
  func.func @_seq_forward_kernel(%arg0: i32, %arg1: memref<256x128xbf16, #tpu.memory_space<vmem>>, %arg2: memref<512x256xbf16, #tpu.memory_space<vmem>>, %arg3: memref<3x256xf32, #tpu.memory_space<vmem>>, %arg4: memref<256x128xf32, #tpu.memory_space<vmem>>) attributes {dimension_semantics = [#tpu.dimension_semantics<parallel>], iteration_bounds = array<i64: 1>, scalar_prefetch = 0 : i64, scratch_operands = 0 : i64, tpu.core_type = #tpu.core_type<tc>, window_params = [{transform_indices = @transform_0, window_bounds = array<i64: 256, 128>}, {pipeline_mode = #tpu.pipeline_mode<synchronous>, transform_indices = @transform_1, window_bounds = array<i64: 512, 256>}, {pipeline_mode = #tpu.pipeline_mode<synchronous>, transform_indices = @transform_2, window_bounds = array<i64: 3, 256>}, {transform_indices = @transform_3, window_bounds = array<i64: 256, 128>}]} {
    %c0 = arith.constant 0 : index
    %c0_0 = arith.constant 0 : index
    %0 = vector.load %arg1[%c0, %c0_0] : memref<256x128xbf16, #tpu.memory_space<vmem>>, vector<256x128xbf16>
    %c0_1 = arith.constant 0 : index
    %c0_2 = arith.constant 0 : index
    %1 = vector.load %arg2[%c0_1, %c0_2] : memref<512x256xbf16, #tpu.memory_space<vmem>>, vector<128x256xbf16>
    %c0_3 = arith.constant 0 : index
    %c0_4 = arith.constant 0 : index
    %2 = vector.load %arg3[%c0_3, %c0_4] : memref<3x256xf32, #tpu.memory_space<vmem>>, vector<1x256xf32>
    %cst = arith.constant dense<0.000000e+00> : vector<256x256xf32>
    %3 = tpu.matmul %0, %1, %cst {dimension_numbers = #tpu.dot_dimension_numbers<[1], [0], [0], [1], [0, 0, 1, 1], [], []>} : vector<256x128xbf16>, vector<128x256xbf16>, vector<256x256xf32> -> vector<256x256xf32>
    %4 = vector.broadcast %2 : vector<1x256xf32> to vector<256x256xf32>
    %5 = arith.addf %3, %4 : vector<256x256xf32>
    %cst_5 = arith.constant 0.000000e+00 : f32
    %6 = vector.broadcast %cst_5 : f32 to vector<256x256xf32>
    %7 = arith.maximumf %5, %6 : vector<256x256xf32>
    %8 = arith.truncf %7 : vector<256x256xf32> to vector<256x256xbf16>
    %c128 = arith.constant 128 : index
    %c0_6 = arith.constant 0 : index
    %9 = vector.load %arg2[%c128, %c0_6] : memref<512x256xbf16, #tpu.memory_space<vmem>>, vector<256x128xbf16>
    %c1 = arith.constant 1 : index
    %c0_7 = arith.constant 0 : index
    %10 = vector.load %arg3[%c1, %c0_7] : memref<3x256xf32, #tpu.memory_space<vmem>>, vector<1x128xf32>
    %cst_8 = arith.constant dense<0.000000e+00> : vector<256x128xf32>
    %11 = tpu.matmul %8, %9, %cst_8 {dimension_numbers = #tpu.dot_dimension_numbers<[1], [0], [0], [1], [0, 0, 1, 1], [], []>} : vector<256x256xbf16>, vector<256x128xbf16>, vector<256x128xf32> -> vector<256x128xf32>
    %12 = vector.broadcast %10 : vector<1x128xf32> to vector<256x128xf32>
    %13 = arith.addf %11, %12 : vector<256x128xf32>
    %cst_9 = arith.constant 0.000000e+00 : f32
    %14 = vector.broadcast %cst_9 : f32 to vector<256x128xf32>
    %15 = arith.maximumf %13, %14 : vector<256x128xf32>
    %16 = arith.truncf %15 : vector<256x128xf32> to vector<256x128xbf16>
    %c384 = arith.constant 384 : index
    %c0_10 = arith.constant 0 : index
    %17 = vector.load %arg2[%c384, %c0_10] : memref<512x256xbf16, #tpu.memory_space<vmem>>, vector<128x128xbf16>
    %c2 = arith.constant 2 : index
    %c0_11 = arith.constant 0 : index
    %18 = vector.load %arg3[%c2, %c0_11] : memref<3x256xf32, #tpu.memory_space<vmem>>, vector<1x128xf32>
    %cst_12 = arith.constant dense<0.000000e+00> : vector<256x128xf32>
    %19 = tpu.matmul %16, %17, %cst_12 {dimension_numbers = #tpu.dot_dimension_numbers<[1], [0], [0], [1], [0, 0, 1, 1], [], []>} : vector<256x128xbf16>, vector<128x128xbf16>, vector<256x128xf32> -> vector<256x128xf32>
    %20 = vector.broadcast %18 : vector<1x128xf32> to vector<256x128xf32>
    %21 = arith.addf %19, %20 : vector<256x128xf32>
    %cst_13 = arith.constant dense<0xFF800000> : vector<256xf32>
    %22 = vector.multi_reduction <maximumf>, %21, %cst_13 [1] : vector<256x128xf32> to vector<256xf32>
    %23 = vector.shape_cast %22 : vector<256xf32> to vector<256x1xf32>
    %24 = vector.broadcast %23 : vector<256x1xf32> to vector<256x128xf32>
    %25 = arith.subf %21, %24 : vector<256x128xf32>
    %26 = math.exp %25 : vector<256x128xf32>
    %cst_14 = arith.constant dense<0.000000e+00> : vector<256xf32>
    %27 = vector.multi_reduction <add>, %26, %cst_14 [1] : vector<256x128xf32> to vector<256xf32>
    %28 = vector.shape_cast %27 : vector<256xf32> to vector<256x1xf32>
    %29 = vector.broadcast %28 : vector<256x1xf32> to vector<256x128xf32>
    %30 = arith.divf %26, %29 : vector<256x128xf32>
    %c0_15 = arith.constant 0 : index
    %c0_16 = arith.constant 0 : index
    %31 = vector.load %arg4[%c0_15, %c0_16] : memref<256x128xf32, #tpu.memory_space<vmem>>, vector<256x128xf32>
    tpu.vector_store %arg4[%c0_15, %c0_16], %30 {strides = array<i32>} : memref<256x128xf32, #tpu.memory_space<vmem>>, vector<256x128xf32>,
    return
  }
  func.func @transform_0(%arg0: i32) -> (i32, i32) {
    %c0_i32 = arith.constant 0 : i32
    %c0_i32_0 = arith.constant 0 : i32
    return %arg0, %c0_i32 : i32, i32
  }
  func.func @transform_1(%arg0: i32) -> (i32, i32) {
    %c0_i32 = arith.constant 0 : i32
    %c0_i32_0 = arith.constant 0 : i32
    %c0_i32_1 = arith.constant 0 : i32
    return %c0_i32, %c0_i32_0 : i32, i32
  }
  func.func @transform_2(%arg0: i32) -> (i32, i32) {
    %c0_i32 = arith.constant 0 : i32
    %c0_i32_0 = arith.constant 0 : i32
    %c0_i32_1 = arith.constant 0 : i32
    return %c0_i32, %c0_i32_0 : i32, i32
  }
  func.func @transform_3(%arg0: i32) -> (i32, i32) {
    %c0_i32 = arith.constant 0 : i32
    %c0_i32_0 = arith.constant 0 : i32
    return %arg0, %c0_i32 : i32, i32
  }
}

</mosaic_0001>

<bundles_post_ra>
// kernel: _forward_jit.1
= control target key start
LH: loop header
LB: loop body
LE: loop exit
PB: predicated region body
PF: predicated region fallthrough
CT: control target
= control target key end

     0   :  { %8 = vsyncpa [#allocation3], 0  ;;  %s2249_s15 = smov [#allocation2]   ;;  %s2250_s17 = smov 128   ;;  %s2961_s0 = inlined_call_operand.vmem [shape: bf16[256,128], index: 0, kind: input, shape index: {}]   ;;  %s2962_s1 = inlined_call_operand.hbm [shape: bf16[512,256], index: 1, kind: input, shape index: {}]   ;;  %s2963_s2 = inlined_call_operand.vmem [shape: f32[3,256], index: 2, kind: input, shape index: {}]   ;;  %s2964_s3 = inlined_call_operand.vmem [shape: f32[256,128], index: 3, kind: output, shape index: {}]  }
   0x1   :  { %s15_s14 = sshll.u32 %s2962_s1, 4  ;;  %s17_s16 = sshll.u32 %s2249_s15, 4  ;;  %s16_s14 = int_to_ptr.hbm [resolvable:$true] %s15_s14  ;;  %s18_s16 = int_to_ptr.vmem [resolvable:$true] %s17_s16 }
   0x2   :  { %s2251_s18 = smov 8  }
   0x3   :  { %23 = dma.hbm_to_vmem [thread:$0]  %s16_s14, 8192, %s18_s16, [#allocation3], %s2250_s17, %s2250_s17, %s2251_s18  }
   0x4   :  { %2247 = dma.done.wait [#allocation3], 8192  }
   0x5   :  { %2248 = vsyncadd [#allocation3], 4294959104  ;;  %v1908_v0 = vld [vmem:[#allocation2 + $0x70] sm:$0xf]  ;;  %v2041_v1 = vld [vmem:[#allocation2 + $0x74] sm:$0xf0] }
   0x6   :  { %v1900_v2 = vld [vmem:[#allocation2 + $0x60] sm:$0xf]  ;;  %v1909_v3 = vor.u32 %v2041_v1, %v1908_v0  ;;  %v2039_v4 = vld [vmem:[#allocation2 + $0x64] sm:$0xf0]  ;;  %v1892_v6 = vld [vmem:[#allocation2 + $0x50] sm:$0xf] }
   0x7   :  { %v1901_v5 = vor.u32 %v2039_v4, %v1900_v2  ;;  %v2037_v7 = vld [vmem:[#allocation2 + $0x54] sm:$0xf0]  ;;  %v1884_v9 = vld [vmem:[#allocation2 + $0x40] sm:$0xf]  ;;  %v2035_v10 = vld [vmem:[#allocation2 + $0x44] sm:$0xf0] }
   0x8   :  { %260 = vmatpush.bf16.msra.mxu0 %v1909_v3  ;;  %2066 = vmatpush.bf16.msra.mxu1 %v1909_v3  ;;  %v1893_v8 = vor.u32 %v2037_v7, %v1892_v6  ;;  %v1885_v11 = vor.u32 %v2035_v10, %v1884_v9  ;;  %v1876_v12 = vld [vmem:[#allocation2 + $0x30] sm:$0xf]  ;;  %v2033_v13 = vld [vmem:[#allocation2 + $0x34] sm:$0xf0]  ;;  %v1868_v15 = vld [vmem:[#allocation2 + $0x20] sm:$0xf] }
   0x9   :  { %2067 = vmatpush.bf16.msra.mxu2 %v1909_v3  ;;  %2068 = vmatpush.bf16.msra.mxu3 %v1909_v3  ;;  %v1877_v14 = vor.u32 %v2033_v13, %v1876_v12  ;;  %v2031_v16 = vld [vmem:[#allocation2 + $0x24] sm:$0xf0]  ;;  %v1860_v18 = vld [vmem:[#allocation2 + $0x10] sm:$0xf]  ;;  %v2029_v19 = vld [vmem:[#allocation2 + $0x14] sm:$0xf0] }
   0xa   :  { %v1869_v17 = vor.u32 %v2031_v16, %v1868_v15  ;;  %v1861_v20 = vor.u32 %v2029_v19, %v1860_v18  ;;  %v1852_v21 = vld [vmem:[#allocation2] sm:$0xf]  ;;  %v2027_v22 = vld [vmem:[#allocation2 + $0x4] sm:$0xf0]  ;;  %v2040_v23 = vld [vmem:[#allocation2 + $0x74] sm:$0xf] }
   0xb   :  { %v1910_v24 = vld [vmem:[#allocation2 + $0x78] sm:$0xf0]  ;;  %v1853_v25 = vor.u32 %v2027_v22, %v1852_v21  ;;  %v2038_v27 = vld [vmem:[#allocation2 + $0x64] sm:$0xf]  ;;  %v1902_v28 = vld [vmem:[#allocation2 + $0x68] sm:$0xf0] }
   0xc   :  { %261 = vmatpush.bf16.msra.mxu0 %v1901_v5  ;;  %2069 = vmatpush.bf16.msra.mxu1 %v1901_v5  ;;  %v1913_v26 = vor.u32 %v2040_v23, %v1910_v24  ;;  %v2010_v29 = vld [vmem:[%s2961_s0] sm:$0xff]  ;;  %v1905_v31 = vor.u32 %v2038_v27, %v1902_v28  ;;  %v2036_v32 = vld [vmem:[#allocation2 + $0x54] sm:$0xf]  ;;  %v1894_v33 = vld [vmem:[#allocation2 + $0x58] sm:$0xf0] }
   0xd   :  { %2070 = vmatpush.bf16.msra.mxu2 %v1901_v5  ;;  %2071 = vmatpush.bf16.msra.mxu3 %v1901_v5  ;;  %v2281_v30 = vld [vmem:[%s2961_s0 + $0x20] sm:$0xff]  ;;  %v1897_v34 = vor.u32 %v2036_v32, %v1894_v33  ;;  %v1886_v36 = vld [vmem:[#allocation2 + $0x48] sm:$0xf0]  ;;  %v2032_v38 = vld [vmem:[#allocation2 + $0x34] sm:$0xf] }
   0xe   :  { %v2034_v35 = vld [vmem:[#allocation2 + $0x44] sm:$0xf]  ;;  %v1878_v39 = vld [vmem:[#allocation2 + $0x38] sm:$0xf0]  ;;  %v1870_v42 = vld [vmem:[#allocation2 + $0x28] sm:$0xf0] }
   0xf   :  { %v1889_v37 = vor.u32 %v2034_v35, %v1886_v36  ;;  %v1881_v40 = vor.u32 %v2032_v38, %v1878_v39  ;;  %v2030_v41 = vld [vmem:[#allocation2 + $0x24] sm:$0xf]  ;;  %v2011_v43 = vld [vmem:[%s2961_s0 + $0x8] sm:$0xff]  ;;  %v2028_v46 = vld [vmem:[#allocation2 + $0x14] sm:$0xf] }
  0x10   :  { %262 = vmatpush.bf16.msra.mxu0 %v1893_v8  ;;  %2072 = vmatpush.bf16.msra.mxu1 %v1893_v8  ;;  %v2290_v44 = vld [vmem:[%s2961_s0 + $0x28] sm:$0xff]  ;;  %v1873_v45 = vor.u32 %v2030_v41, %v1870_v42  ;;  %v1862_v47 = vld [vmem:[#allocation2 + $0x18] sm:$0xf0]  ;;  %v2026_v49 = vld [vmem:[#allocation2 + $0x4] sm:$0xf] }
  0x11   :  { %2073 = vmatpush.bf16.msra.mxu2 %v1893_v8  ;;  %2074 = vmatpush.bf16.msra.mxu3 %v1893_v8  ;;  %v1865_v48 = vor.u32 %v2028_v46, %v1862_v47  ;;  %v1854_v50 = vld [vmem:[#allocation2 + $0x8] sm:$0xf0]  ;;  %v2012_v52 = vld [vmem:[%s2961_s0 + $0x10] sm:$0xff]  ;;  %v2305_v54 = vld [vmem:[%s2961_s0 + $0x40] sm:$0xff] }
  0x12   :  { %v1857_v51 = vor.u32 %v2026_v49, %v1854_v50  ;;  %v2299_v53 = vld [vmem:[%s2961_s0 + $0x30] sm:$0xff]  ;;  %v2013_v55 = vld [vmem:[%s2961_s0 + $0x18] sm:$0xff]  ;;  %v2320_v57 = vld [vmem:[%s2961_s0 + $0x48] sm:$0xff] }
  0x13   :  { %v2314_v56 = vld [vmem:[%s2961_s0 + $0x38] sm:$0xff]  ;;  %v2326_v58 = vld [vmem:[%s2961_s0 + $0x50] sm:$0xff]  ;;  %v1940_v62 = vld [vmem:[#allocation2 + $0xe0] sm:$0xf] }
  0x14   :  { %263 = vmatpush.bf16.msra.mxu0 %v1885_v11  ;;  %2075 = vmatpush.bf16.msra.mxu1 %v1885_v11  ;;  %v1944_v59 = vld [vmem:[#allocation2 + $0xf0] sm:$0xf]  ;;  %v2049_v60 = vld [vmem:[#allocation2 + $0xf4] sm:$0xf0]  ;;  %v2048_v63 = vld [vmem:[#allocation2 + $0xe4] sm:$0xf0] }
  0x15   :  { %2076 = vmatpush.bf16.msra.mxu2 %v1885_v11  ;;  %2077 = vmatpush.bf16.msra.mxu3 %v1885_v11  ;;  %v1945_v61 = vor.u32 %v2049_v60, %v1944_v59  ;;  %v1941_v0 = vor.u32 %v2048_v63, %v1940_v62  ;;  %v1936_v1 = vld [vmem:[#allocation2 + $0xd0] sm:$0xf]  ;;  %v2047_v2 = vld [vmem:[#allocation2 + $0xd4] sm:$0xf0]  ;;  %v1932_v5 = vld [vmem:[#allocation2 + $0xc0] sm:$0xf] }
  0x16   :  { %v1937_v3 = vor.u32 %v2047_v2, %v1936_v1  ;;  %v2332_v4 = vld [vmem:[%s2961_s0 + $0x58] sm:$0xff]  ;;  %v2046_v6 = vld [vmem:[#allocation2 + $0xc4] sm:$0xf0]  ;;  %v1928_v8 = vld [vmem:[#allocation2 + $0xb0] sm:$0xf] }
  0x17   :  { %v1933_v7 = vor.u32 %v2046_v6, %v1932_v5  ;;  %v2045_v9 = vld [vmem:[#allocation2 + $0xb4] sm:$0xf0]  ;;  %v1924_v11 = vld [vmem:[#allocation2 + $0xa0] sm:$0xf]  ;;  %v2044_v12 = vld [vmem:[#allocation2 + $0xa4] sm:$0xf0] }
  0x18   :  { %264 = vmatpush.bf16.msra.mxu0 %v1877_v14  ;;  %2078 = vmatpush.bf16.msra.mxu1 %v1877_v14  ;;  %v1929_v10 = vor.u32 %v2045_v9, %v1928_v8  ;;  %v1925_v13 = vor.u32 %v2044_v12, %v1924_v11  ;;  %v1920_v15 = vld [vmem:[#allocation2 + $0x90] sm:$0xf]  ;;  %v2043_v16 = vld [vmem:[#allocation2 + $0x94] sm:$0xf0]  ;;  %v1916_v18 = vld [vmem:[#allocation2 + $0x80] sm:$0xf] }
  0x19   :  { %2079 = vmatpush.bf16.msra.mxu2 %v1877_v14  ;;  %2080 = vmatpush.bf16.msra.mxu3 %v1877_v14  ;;  %v2338_v14 = vld [vmem:[%s2961_s0 + $0x60] sm:$0xff]  ;;  %v2042_v19 = vld [vmem:[#allocation2 + $0x84] sm:$0xf0]  ;;  %v1976_v21 = vld [vmem:[#allocation2 + $0x170] sm:$0xf] }
  0x1a   :  { %v2057_v22 = vld [vmem:[#allocation2 + $0x174] sm:$0xf0]  ;;  %v2344_v24 = vld [vmem:[%s2961_s0 + $0x68] sm:$0xff]  ;;  %v1968_v28 = vld [vmem:[#allocation2 + $0x150] sm:$0xf] }
  0x1b   :  { %v1977_v23 = vor.u32 %v2057_v22, %v1976_v21  ;;  %v2359_v36 = vld [vmem:[%s2961_s0 + $0x70] sm:$0xff]  ;;  %v2054_v38 = vld [vmem:[#allocation2 + $0x144] sm:$0xf0]  ;;  %v2372_v62 = vld [vmem:[%s2961_s0 + $0x78] sm:$0xff] }
  0x1c   :  { %265 = vmatpush.bf16.msra.mxu0 %v1869_v17  ;;  %2081 = vmatpush.bf16.msra.mxu1 %v1869_v17  ;;  %v1956_v63 = vld [vmem:[#allocation2 + $0x120] sm:$0xf]  ;;  %v2050_v21 = vld [vmem:[#allocation2 + $0x104] sm:$0xf0] }
  0x1d   :  { %2082 = vmatpush.bf16.msra.mxu2 %v1869_v17  ;;  %2083 = vmatpush.bf16.msra.mxu3 %v1869_v17  ;;  %v1921_v17 = vor.u32 %v2043_v16, %v1920_v15  ;;  %v1952_v15 = vld [vmem:[#allocation2 + $0x110] sm:$0xf]  ;;  %v2051_v16 = vld [vmem:[#allocation2 + $0x114] sm:$0xf0] }
  0x20   :  { %266 = vmatpush.bf16.msra.mxu0 %v1861_v20  ;;  %2084 = vmatpush.bf16.msra.mxu1 %v1861_v20 }
  0x21   :  { %2085 = vmatpush.bf16.msra.mxu2 %v1861_v20  ;;  %2086 = vmatpush.bf16.msra.mxu3 %v1861_v20  ;;  %v1917_v20 = vor.u32 %v2042_v19, %v1916_v18  ;;  %v1953_v19 = vor.u32 %v2051_v16, %v1952_v15 }
  0x24   :  { %267 = vmatpush.bf16.msra.mxu0 %v1853_v25  ;;  %2087 = vmatpush.bf16.msra.mxu1 %v1853_v25 }
  0x25   :  { %2088 = vmatpush.bf16.msra.mxu2 %v1853_v25  ;;  %2089 = vmatpush.bf16.msra.mxu3 %v1853_v25  ;;  %v1972_v25 = vld [vmem:[#allocation2 + $0x160] sm:$0xf] }
  0x27   :  { %268 = vmatmul.bf16.vlgmr.msra.gmra.mxu0 %v2010_v29  ;;  %288 = vmatmul.bf16.vlgmr.msra.gmra.mxu1 %v2281_v30 }
  0x28   :  { %349 = vmatpush.bf16.msrb.mxu1 %v1913_v26  ;;  %308 = vmatmul.bf16.vlgmr.msra.gmra.mxu2 %v2305_v54  ;;  %v2056_v26 = vld [vmem:[#allocation2 + $0x164] sm:$0xf0] }
  0x29   :  { %664 = vmatpush.bf16.msrb.mxu2 %v1945_v61  ;;  %328 = vmatmul.bf16.vlgmr.msra.gmra.mxu3 %v2338_v14  ;;  %v1973_v27 = vor.u32 %v2056_v26, %v1972_v25 }
  0x2a   :  { %753 = vmatpush.bf16.msrb.mxu3 %v1977_v23 }
  0x2c   :  { %350 = vmatpush.bf16.msrb.mxu1 %v1905_v31  ;;  %v2350_v31 = vld [vmem:[%s2963_s2] ss:$4 sm:$0x3] }
  0x2d   :  { %665 = vmatpush.bf16.msrb.mxu2 %v1941_v0  ;;  %v2353_v35 = vperm.slane %v2350_v31, 0  ;;  %v2052_v0 = vld [vmem:[#allocation2 + $0x124] sm:$0xf0] }
  0x2e   :  { %754 = vmatpush.bf16.msrb.mxu3 %v1973_v27  ;;  %v1957_v2 = vor.u32 %v2052_v0, %v1956_v63 }
  0x30   :  { %351 = vmatpush.bf16.msrb.mxu1 %v1897_v34 }
  0x31   :  { %666 = vmatpush.bf16.msrb.mxu2 %v1937_v3 }
  0x34   :  { %352 = vmatpush.bf16.msrb.mxu1 %v1889_v37  ;;  %v1964_v37 = vld [vmem:[#allocation2 + $0x140] sm:$0xf] }
  0x35   :  { %667 = vmatpush.bf16.msrb.mxu2 %v1933_v7 }
  0x37   :  { %273 = vmatmul.bf16.gmra.mxu0 %v2011_v43  ;;  %293 = vmatmul.bf16.gmra.mxu1 %v2290_v44 }
  0x38   :  { %353 = vmatpush.bf16.msrb.mxu1 %v1881_v40  ;;  %313 = vmatmul.bf16.gmra.mxu2 %v2320_v57  ;;  %v1965_v40 = vor.u32 %v2054_v38, %v1964_v37 }
  0x39   :  { %668 = vmatpush.bf16.msrb.mxu2 %v1929_v10  ;;  %333 = vmatmul.bf16.gmra.mxu3 %v2344_v24 }
  0x3c   :  { %354 = vmatpush.bf16.msrb.mxu1 %v1873_v45 }
  0x3d   :  { %669 = vmatpush.bf16.msrb.mxu2 %v1925_v13 }
  0x40   :  { %355 = vmatpush.bf16.msrb.mxu1 %v1865_v48 }
  0x41   :  { %670 = vmatpush.bf16.msrb.mxu2 %v1921_v17 }
  0x44   :  { %356 = vmatpush.bf16.msrb.mxu1 %v1857_v51 }
  0x45   :  { %671 = vmatpush.bf16.msrb.mxu2 %v1917_v20  ;;  %v1948_v20 = vld [vmem:[#allocation2 + $0x100] sm:$0xf] }
  0x46   :  { %v1949_v22 = vor.u32 %v2050_v21, %v1948_v20 }
  0x47   :  { %278 = vmatmul.bf16.gmra.mxu0 %v2012_v52  ;;  %298 = vmatmul.bf16.gmra.mxu1 %v2299_v53 }
  0x48   :  { %318 = vmatmul.bf16.gmra.mxu2 %v2326_v58 }
  0x49   :  { %338 = vmatmul.bf16.gmra.mxu3 %v2359_v36 }
  0x57   :  { %283 = vmatmul.bf16.gmra.mxu0 %v2013_v55  ;;  %303 = vmatmul.bf16.gmra.mxu1 %v2314_v56 }
  0x58   :  { %323 = vmatmul.bf16.gmra.mxu2 %v2332_v4 }
  0x59   :  { %343 = vmatmul.bf16.gmra.mxu3 %v2372_v62 }
  0x67   :  { %357 = vmatmul.bf16.vlgmr.msrb.gmra.mxu1 %v2010_v29  ;;  %v2055_v29 = vld [vmem:[#allocation2 + $0x154] sm:$0xf0] }
  0x68   :  { %v1969_v34 = vor.u32 %v2055_v29, %v1968_v28 }
  0x6a   :  { %755 = vmatpush.bf16.msrb.mxu3 %v1969_v34 }
  0x6e   :  { %756 = vmatpush.bf16.msrb.mxu3 %v1965_v40 }
  0x77   :  { %362 = vmatmul.bf16.gmra.mxu1 %v2011_v43 }
  0x87   :  { %367 = vmatmul.bf16.gmra.mxu1 %v2012_v52  ;;  %v1960_v52 = vld [vmem:[#allocation2 + $0x130] sm:$0xf] }
  0x97   :  { %372 = vmatmul.bf16.gmra.mxu1 %v2013_v55  ;;  %v2053_v55 = vld [vmem:[#allocation2 + $0x134] sm:$0xf0] }
  0x98   :  { %v1961_v61 = vor.u32 %v2053_v55, %v1960_v52 }
  0x9a   :  { %757 = vmatpush.bf16.msrb.mxu3 %v1961_v61 }
  0x9e   :  { %758 = vmatpush.bf16.msrb.mxu3 %v1957_v2 }
  0xa2   :  { %759 = vmatpush.bf16.msrb.mxu3 %v1953_v19 }
  0xa4   :  { %v269_v32 = vpop.f32.mrf.mxu0  ;;  %v289_v33 = vpop.f32.mrf.mxu1 }
  0xa5   :  { %v270_v39 = vadd.f32 %v269_v32, %v2353_v35  ;;  %v290_v41 = vadd.f32 %v289_v33, %v2353_v35 }
  0xa6   :  { %760 = vmatpush.bf16.msrb.mxu3 %v1949_v22 }
  0xa7   :  { %377 = vmatmul.bf16.gmra.mxu1 %v2281_v30  ;;  %v438_v45 = vmax.f32 %v270_v39, 0.0  ;;  %v454_v47 = vmax.f32 %v290_v41, 0.0 }
  0xac   :  { %v271_v42 = vpop.f32.mrf.mxu0  ;;  %v291_v43 = vpop.f32.mrf.mxu1 }
  0xad   :  { %v272_v30 = vadd.f32 %v271_v42, %v2353_v35  ;;  %v292_v46 = vadd.f32 %v291_v43, %v2353_v35 }
  0xaf   :  { %v440_v48 = vmax.f32 %v272_v30, 0.0  ;;  %v456_v49 = vmax.f32 %v292_v46, 0.0 }
  0xb1   :  { %v502_v50 = vpack.c.bf16 %v440_v48, %v438_v45  ;;  %v2366_v51 = vpack.c.bf16 %v456_v49, %v454_v47 }
  0xb3   :  { %672 = vmatmul.bf16.vlgmr.msrb.gmra.mxu2 %v502_v50 }
  0xb4   :  { %v274_v59 = vpop.f32.mrf.mxu0  ;;  %v294_v60 = vpop.f32.mrf.mxu1 }
  0xb5   :  { %v275_v1 = vadd.f32 %v274_v59, %v2353_v35  ;;  %v295_v3 = vadd.f32 %v294_v60, %v2353_v35  ;;  %v309_v60 = vpop.f32.mrf.mxu2 }
  0xb7   :  { %382 = vmatmul.bf16.gmra.mxu1 %v2290_v44  ;;  %v442_v7 = vmax.f32 %v275_v1, 0.0  ;;  %v458_v9 = vmax.f32 %v295_v3, 0.0 }
  0xbc   :  { %v276_v5 = vpop.f32.mrf.mxu0  ;;  %v296_v6 = vpop.f32.mrf.mxu1 }
  0xbd   :  { %v277_v44 = vadd.f32 %v276_v5, %v2353_v35  ;;  %v297_v8 = vadd.f32 %v296_v6, %v2353_v35  ;;  %v311_v3 = vpop.f32.mrf.mxu2 }
  0xbf   :  { %v444_v10 = vmax.f32 %v277_v44, 0.0  ;;  %v460_v11 = vmax.f32 %v297_v8, 0.0 }
  0xc1   :  { %v504_v12 = vpack.c.bf16 %v444_v10, %v442_v7  ;;  %v2379_v13 = vpack.c.bf16 %v460_v11, %v458_v9 }
  0xc3   :  { %677 = vmatmul.bf16.gmra.mxu2 %v504_v12 }
  0xc4   :  { %v279_v17 = vpop.f32.mrf.mxu0  ;;  %v299_v18 = vpop.f32.mrf.mxu1 }
  0xc5   :  { %v280_v23 = vadd.f32 %v279_v17, %v2353_v35  ;;  %v300_v25 = vadd.f32 %v299_v18, %v2353_v35  ;;  %v314_v7 = vpop.f32.mrf.mxu2 }
  0xc7   :  { %387 = vmatmul.bf16.gmra.mxu1 %v2299_v53  ;;  %v446_v28 = vmax.f32 %v280_v23, 0.0  ;;  %v462_v33 = vmax.f32 %v300_v25, 0.0 }
  0xcc   :  { %v281_v26 = vpop.f32.mrf.mxu0  ;;  %v301_v27 = vpop.f32.mrf.mxu1 }
  0xcd   :  { %v282_v29 = vadd.f32 %v281_v26, %v2353_v35  ;;  %v302_v32 = vadd.f32 %v301_v27, %v2353_v35  ;;  %v316_v12 = vpop.f32.mrf.mxu2 }
  0xcf   :  { %v448_v34 = vmax.f32 %v282_v29, 0.0  ;;  %v464_v37 = vmax.f32 %v302_v32, 0.0  ;;  %v310_v29 = vadd.f32 %v309_v60, %v2353_v35  ;;  %v312_v32 = vadd.f32 %v311_v3, %v2353_v35  ;;  %v2000_v60 = vld [vmem:[#allocation2 + $0x1d0] sm:$0xf] }
  0xd1   :  { %v506_v38 = vpack.c.bf16 %v448_v34, %v446_v28  ;;  %v514_v53 = vpack.c.bf16 %v464_v37, %v462_v33  ;;  %v2065_v33 = vld [vmem:[#allocation2 + $0x1f4] sm:$0xf0]  ;;  %v2417_v34 = vpop.f32.mrf.mxu3 }
  0xd3   :  { %682 = vmatmul.bf16.gmra.mxu2 %v506_v38  ;;  %v470_v38 = vmax.f32 %v310_v29, 0.0  ;;  %v2060_v29 = vld [vmem:[#allocation2 + $0x1a4] sm:$0xf0] }
  0xd4   :  { %v284_v39 = vpop.f32.mrf.mxu0  ;;  %v304_v40 = vpop.f32.mrf.mxu1 }
  0xd5   :  { %v285_v41 = vadd.f32 %v284_v39, %v2353_v35  ;;  %v305_v42 = vadd.f32 %v304_v40, %v2353_v35  ;;  %v2405_v16 = vpop.f32.mrf.mxu2 }
  0xd7   :  { %392 = vmatmul.bf16.gmra.mxu1 %v2314_v56  ;;  %v450_v30 = vmax.f32 %v285_v41, 0.0  ;;  %v466_v48 = vmax.f32 %v305_v42, 0.0  ;;  %v2392_v56 = vperm.slane %v2350_v31, 1 }
  0xdc   :  { %v286_v43 = vpop.f32.mrf.mxu0  ;;  %v306_v45 = vpop.f32.mrf.mxu1 }
  0xdd   :  { %v287_v46 = vadd.f32 %v286_v43, %v2353_v35  ;;  %v307_v47 = vadd.f32 %v306_v45, %v2353_v35 }
  0xdf   :  { %v452_v49 = vmax.f32 %v287_v46, 0.0  ;;  %v468_v50 = vmax.f32 %v307_v47, 0.0  ;;  %v2004_v46 = vld [vmem:[#allocation2 + $0x1e0] sm:$0xf] }
  0xe1   :  { %v508_v52 = vpack.c.bf16 %v452_v49, %v450_v30  ;;  %v516_v55 = vpack.c.bf16 %v468_v50, %v466_v48  ;;  %v2423_v49 = vpop.f32.mrf.mxu3 }
  0xe3   :  { %687 = vmatmul.bf16.gmra.mxu2 %v508_v52 }
  0xe4   :  { %v358_v59 = vpop.f32.mrf.mxu1 }
  0xe5   :  { %v359_v61 = vadd.f32 %v358_v59, %v2392_v56  ;;  %v317_v59 = vadd.f32 %v316_v12, %v2353_v35 }
  0xe7   :  { %397 = vmatmul.bf16.gmra.mxu1 %v2305_v54  ;;  %v439_v1 = vmax.f32 %v359_v61, 0.0  ;;  %v2063_v61 = vld [vmem:[#allocation2 + $0x1d4] sm:$0xf0] }
  0xec   :  { %v360_v63 = vpop.f32.mrf.mxu1 }
  0xed   :  { %v361_v0 = vadd.f32 %v360_v63, %v2392_v56  ;;  %v2001_v63 = vor.u32 %v2063_v61, %v2000_v60 }
  0xef   :  { %v441_v2 = vmax.f32 %v361_v0, 0.0 }
  0xf1   :  { %v503_v5 = vpack.c.bf16 %v441_v2, %v439_v1  ;;  %v476_v1 = vmax.f32 %v317_v59, 0.0 }
  0xf3   :  { %692 = vmatmul.bf16.gmra.mxu2 %v2366_v51  ;;  %761 = vmatmul.bf16.vlgmr.msrb.gmra.mxu3 %v503_v5  ;;  %v2431_v5 = vpop.f32.mrf.mxu3 }
  0xf4   :  { %v363_v6 = vpop.f32.mrf.mxu1 }
  0xf5   :  { %v364_v31 = vadd.f32 %v363_v6, %v2392_v56 }
  0xf7   :  { %402 = vmatmul.bf16.gmra.mxu1 %v2320_v57  ;;  %v443_v8 = vmax.f32 %v364_v31, 0.0 }
  0xfb   :  { %v2436_v12 = vpop.f32.mrf.mxu3 }
  0xfc   :  { %v365_v44 = vpop.f32.mrf.mxu1 }
  0xfd   :  { %v366_v54 = vadd.f32 %v365_v44, %v2392_v56 }
  0xff   :  { %v445_v9 = vmax.f32 %v366_v54, 0.0 }
 0x101   :  { %v505_v10 = vpack.c.bf16 %v445_v9, %v443_v8  ;;  %v1996_v8 = vld [vmem:[#allocation2 + $0x1c0] sm:$0xf] }
 0x103   :  { %697 = vmatmul.bf16.gmra.mxu2 %v2379_v13  ;;  %766 = vmatmul.bf16.gmra.mxu3 %v505_v10  ;;  %v2408_v13 = vpop.f32.mrf.mxu2 }
 0x104   :  { %v368_v11 = vpop.f32.mrf.mxu1 }
 0x105   :  { %v369_v51 = vadd.f32 %v368_v11, %v2392_v56 }
 0x107   :  { %407 = vmatmul.bf16.gmra.mxu1 %v2326_v58  ;;  %v447_v17 = vmax.f32 %v369_v51, 0.0  ;;  %v320_v51 = vadd.f32 %v2405_v16, %v2353_v35 }
 0x10b   :  { %v2412_v27 = vpop.f32.mrf.mxu2 }
 0x10c   :  { %v370_v15 = vpop.f32.mrf.mxu1 }
 0x10d   :  { %v371_v57 = vadd.f32 %v370_v15, %v2392_v56  ;;  %v322_v15 = vadd.f32 %v2408_v13, %v2353_v35 }
 0x10f   :  { %v449_v18 = vmax.f32 %v371_v57, 0.0  ;;  %v1992_v57 = vld [vmem:[#allocation2 + $0x1b0] sm:$0xf] }
 0x111   :  { %v507_v19 = vpack.c.bf16 %v449_v18, %v447_v17  ;;  %v2061_v17 = vld [vmem:[#allocation2 + $0x1b4] sm:$0xf0] }
 0x113   :  { %702 = vmatmul.bf16.gmra.mxu2 %v514_v53  ;;  %771 = vmatmul.bf16.gmra.mxu3 %v507_v19  ;;  %v472_v53 = vmax.f32 %v312_v32, 0.0  ;;  %v2420_v41 = vpop.f32.mrf.mxu2  ;;  %v1993_v19 = vor.u32 %v2061_v17, %v1992_v57  ;;  %v337_v57 = vadd.f32 %v2436_v12, %v2353_v35 }
 0x114   :  { %v373_v20 = vpop.f32.mrf.mxu1 }
 0x115   :  { %v374_v21 = vadd.f32 %v373_v20, %v2392_v56  ;;  %v518_v30 = vpack.c.bf16 %v472_v53, %v470_v38  ;;  %v478_v20 = vmax.f32 %v320_v51, 0.0  ;;  %v327_v38 = vadd.f32 %v2420_v41, %v2353_v35  ;;  %v1984_v53 = vld [vmem:[#allocation2 + $0x190] sm:$0xf] }
 0x117   :  { %412 = vmatmul.bf16.gmra.mxu1 %v2332_v4  ;;  %v451_v23 = vmax.f32 %v374_v21, 0.0  ;;  %v2008_v4 = vld [vmem:[#allocation2 + $0x1f0] sm:$0xf]  ;;  %v480_v21 = vmax.f32 %v322_v15, 0.0  ;;  %v335_v15 = vadd.f32 %v2431_v5, %v2353_v35 }
 0x118   :  { %v2009_v37 = vor.u32 %v2065_v33, %v2008_v4 }
 0x11a   :  { %956 = vmatpush.bf16.msrb.mxu0 %v2009_v37  ;;  %v325_v37 = vadd.f32 %v2412_v27, %v2353_v35 }
 0x11c   :  { %v375_v58 = vpop.f32.mrf.mxu1 }
 0x11d   :  { %v376_v22 = vadd.f32 %v375_v58, %v2392_v56 }
 0x11f   :  { %v453_v25 = vmax.f32 %v376_v22, 0.0 }
 0x121   :  { %v509_v26 = vpack.c.bf16 %v453_v25, %v451_v23 }
 0x123   :  { %707 = vmatmul.bf16.gmra.mxu2 %v516_v55  ;;  %776 = vmatmul.bf16.gmra.mxu3 %v509_v26  ;;  %v315_v55 = vadd.f32 %v314_v7, %v2353_v35  ;;  %v522_v26 = vpack.c.bf16 %v480_v21, %v478_v20  ;;  %v490_v21 = vmax.f32 %v335_v15, 0.0 }
 0x124   :  { %v378_v28 = vpop.f32.mrf.mxu1 }
 0x125   :  { %v379_v39 = vadd.f32 %v378_v28, %v2392_v56  ;;  %v474_v0 = vmax.f32 %v315_v55, 0.0  ;;  %v2447_v28 = vpop.f32.mrf.mxu3 }
 0x127   :  { %417 = vmatmul.bf16.gmra.mxu1 %v2338_v14  ;;  %v455_v43 = vmax.f32 %v379_v39, 0.0  ;;  %v2064_v14 = vld [vmem:[#allocation2 + $0x1e4] sm:$0xf0]  ;;  %v520_v54 = vpack.c.bf16 %v476_v1, %v474_v0  ;;  %v2059_v39 = vld [vmem:[#allocation2 + $0x194] sm:$0xf0]  ;;  %v330_v0 = vadd.f32 %v2417_v34, %v2353_v35  ;;  %v332_v1 = vadd.f32 %v2423_v49, %v2353_v35 }
 0x128   :  { %v2005_v47 = vor.u32 %v2064_v14, %v2004_v46  ;;  %v2479_v49 = vld [vmem:[%s2963_s2 + $0x1] ss:$0 sm:$0xff] }
 0x12a   :  { %957 = vmatpush.bf16.msrb.mxu0 %v2005_v47 }
 0x12c   :  { %v380_v40 = vpop.f32.mrf.mxu1 }
 0x12d   :  { %v381_v42 = vadd.f32 %v380_v40, %v2392_v56  ;;  %v1985_v40 = vor.u32 %v2059_v39, %v1984_v53  ;;  %v340_v53 = vadd.f32 %v2447_v28, %v2353_v35 }
 0x12e   :  { %958 = vmatpush.bf16.msrb.mxu0 %v2001_v63 }
 0x12f   :  { %v457_v45 = vmax.f32 %v381_v42, 0.0  ;;  %v2456_v42 = vpop.f32.mrf.mxu3 }
 0x130   :  { %v342_v39 = vadd.f32 %v2456_v42, %v2353_v35 }
 0x131   :  { %v511_v48 = vpack.c.bf16 %v457_v45, %v455_v43  ;;  %v482_v43 = vmax.f32 %v325_v37, 0.0  ;;  %v484_v45 = vmax.f32 %v327_v38, 0.0 }
 0x133   :  { %712 = vmatmul.bf16.gmra.mxu2 %v518_v30  ;;  %781 = vmatmul.bf16.gmra.mxu3 %v511_v48  ;;  %v524_v41 = vpack.c.bf16 %v484_v45, %v482_v43  ;;  %v494_v45 = vmax.f32 %v340_v53, 0.0 }
 0x134   :  { %v383_v50 = vpop.f32.mrf.mxu1 }
 0x135   :  { %v384_v2 = vadd.f32 %v383_v50, %v2392_v56  ;;  %v1980_v50 = vld [vmem:[#allocation2 + $0x180] sm:$0xf] }
 0x136   :  { %v2425_v52 = vpop.f32.mrf.mxu2 }
 0x137   :  { %422 = vmatmul.bf16.gmra.mxu1 %v2344_v24  ;;  %v459_v7 = vmax.f32 %v384_v2, 0.0  ;;  %v2062_v24 = vld [vmem:[#allocation2 + $0x1c4] sm:$0xf0]  ;;  %v2462_v60 = vpop.f32.mrf.mxu3 }
 0x138   :  { %v1997_v9 = vor.u32 %v2062_v24, %v1996_v8 }
 0x13a   :  { %959 = vmatpush.bf16.msrb.mxu0 %v1997_v9 }
 0x13c   :  { %v385_v3 = vpop.f32.mrf.mxu1 }
 0x13d   :  { %v386_v6 = vadd.f32 %v385_v3, %v2392_v56 }
 0x13e   :  { %v2434_v31 = vpop.f32.mrf.mxu2  ;;  %960 = vmatpush.bf16.msrb.mxu0 %v1993_v19  ;;  %v674_v19 = vadd.f32 %v2479_v49, %v2425_v52 }
 0x13f   :  { %v461_v44 = vmax.f32 %v386_v6, 0.0  ;;  %v486_v6 = vmax.f32 %v330_v0, 0.0 }
 0x141   :  { %v513_v10 = vpack.c.bf16 %v461_v44, %v459_v7  ;;  %v488_v7 = vmax.f32 %v332_v1, 0.0 }
 0x143   :  { %717 = vmatmul.bf16.gmra.mxu2 %v520_v54  ;;  %786 = vmatmul.bf16.gmra.mxu3 %v513_v10  ;;  %v2472_v54 = vpop.f32.mrf.mxu3 }
 0x144   :  { %v388_v11 = vpop.f32.mrf.mxu1 }
 0x145   :  { %v389_v58 = vadd.f32 %v388_v11, %v2392_v56  ;;  %v526_v11 = vpack.c.bf16 %v488_v7, %v486_v6  ;;  %v347_v6 = vadd.f32 %v2472_v54, %v2353_v35 }
 0x146   :  { %v2443_v18 = vpop.f32.mrf.mxu2 }
 0x147   :  { %427 = vmatmul.bf16.gmra.mxu1 %v2359_v36  ;;  %v463_v25 = vmax.f32 %v389_v58, 0.0  ;;  %v1988_v36 = vld [vmem:[#allocation2 + $0x1a0] sm:$0xf] }
 0x148   :  { %v1989_v4 = vor.u32 %v2060_v29, %v1988_v36 }
 0x14a   :  { %961 = vmatpush.bf16.msrb.mxu0 %v1989_v4 }
 0x14c   :  { %v390_v22 = vpop.f32.mrf.mxu1 }
 0x14d   :  { %v391_v23 = vadd.f32 %v390_v22, %v2392_v56  ;;  %v676_v22 = vadd.f32 %v2479_v49, %v2434_v31 }
 0x14e   :  { %v2449_v32 = vpop.f32.mrf.mxu2  ;;  %962 = vmatpush.bf16.msrb.mxu0 %v1985_v40  ;;  %v679_v40 = vadd.f32 %v2479_v49, %v2443_v18 }
 0x14f   :  { %v465_v16 = vmax.f32 %v391_v23, 0.0  ;;  %v492_v23 = vmax.f32 %v337_v57, 0.0 }
 0x151   :  { %v515_v13 = vpack.c.bf16 %v465_v16, %v463_v25 }
 0x153   :  { %722 = vmatmul.bf16.gmra.mxu2 %v522_v26  ;;  %791 = vmatmul.bf16.gmra.mxu3 %v515_v13 }
 0x154   :  { %v393_v33 = vpop.f32.mrf.mxu1 }
 0x155   :  { %v394_v30 = vadd.f32 %v393_v33, %v2392_v56  ;;  %v528_v33 = vpack.c.bf16 %v492_v23, %v490_v21 }
 0x156   :  { %v2459_v46 = vpop.f32.mrf.mxu2 }
 0x157   :  { %432 = vmatmul.bf16.gmra.mxu1 %v2372_v62  ;;  %v467_v47 = vmax.f32 %v394_v30, 0.0  ;;  %v2058_v62 = vld [vmem:[#allocation2 + $0x184] sm:$0xf0]  ;;  %v684_v7 = vadd.f32 %v2479_v49, %v2459_v46 }
 0x158   :  { %v1981_v55 = vor.u32 %v2058_v62, %v1980_v50 }
 0x15a   :  { %963 = vmatpush.bf16.msrb.mxu0 %v1981_v55 }
 0x15c   :  { %v395_v14 = vpop.f32.mrf.mxu1 }
 0x15d   :  { %v396_v27 = vadd.f32 %v395_v14, %v2392_v56  ;;  %v681_v14 = vadd.f32 %v2479_v49, %v2449_v32 }
 0x15e   :  { %v2464_v63 = vpop.f32.mrf.mxu2 }
 0x15f   :  { %v469_v48 = vmax.f32 %v396_v27, 0.0  ;;  %v496_v27 = vmax.f32 %v342_v39, 0.0 }
 0x161   :  { %v517_v59 = vpack.c.bf16 %v469_v48, %v467_v47 }
 0x163   :  { %727 = vmatmul.bf16.gmra.mxu2 %v524_v41  ;;  %796 = vmatmul.bf16.gmra.mxu3 %v517_v59 }
 0x164   :  { %v398_v61 = vpop.f32.mrf.mxu1 }
 0x165   :  { %v399_v2 = vadd.f32 %v398_v61, %v2392_v56  ;;  %v530_v61 = vpack.c.bf16 %v496_v27, %v494_v45 }
 0x166   :  { %v2474_v9 = vpop.f32.mrf.mxu2 }
 0x167   :  { %v471_v8 = vmax.f32 %v399_v2, 0.0  ;;  %v345_v2 = vadd.f32 %v2462_v60, %v2353_v35 }
 0x16c   :  { %v400_v3 = vpop.f32.mrf.mxu1 }
 0x16d   :  { %v401_v44 = vadd.f32 %v400_v3, %v2392_v56 }
 0x16e   :  { %v2485_v17 = vpop.f32.mrf.mxu2 }
 0x16f   :  { %v473_v24 = vmax.f32 %v401_v44, 0.0 }
 0x171   :  { %v519_v10 = vpack.c.bf16 %v473_v24, %v471_v8  ;;  %v498_v8 = vmax.f32 %v345_v2, 0.0 }
 0x173   :  { %732 = vmatmul.bf16.gmra.mxu2 %v526_v11  ;;  %801 = vmatmul.bf16.gmra.mxu3 %v519_v10  ;;  %v686_v10 = vadd.f32 %v2479_v49, %v2464_v63  ;;  %v500_v11 = vmax.f32 %v347_v6, 0.0  ;;  %v689_v63 = vadd.f32 %v2479_v49, %v2474_v9 }
 0x174   :  { %v403_v34 = vpop.f32.mrf.mxu1 }
 0x175   :  { %v404_v20 = vadd.f32 %v403_v34, %v2392_v56  ;;  %v532_v21 = vpack.c.bf16 %v500_v11, %v498_v8 }
 0x176   :  { %v762_v51 = vpop.f32.mrf.mxu3  ;;  %v2493_v37 = vpop.f32.mrf.mxu2 }
 0x177   :  { %v763_v25 = vadd.f32 %v762_v51, %v674_v19  ;;  %v475_v26 = vmax.f32 %v404_v20, 0.0 }
 0x179   :  { %v842_v36 = vmax.f32 %v763_v25, 0.0 }
 0x17c   :  { %v405_v58 = vpop.f32.mrf.mxu1 }
 0x17d   :  { %v406_v16 = vadd.f32 %v405_v58, %v2392_v56 }
 0x17e   :  { %v764_v5 = vpop.f32.mrf.mxu3  ;;  %v2505_v41 = vpop.f32.mrf.mxu2 }
 0x17f   :  { %v477_v13 = vmax.f32 %v406_v16, 0.0  ;;  %v765_v12 = vadd.f32 %v764_v5, %v676_v22 }
 0x181   :  { %v521_v29 = vpack.c.bf16 %v477_v13, %v475_v26  ;;  %v843_v4 = vmax.f32 %v765_v12, 0.0  ;;  %v691_v26 = vadd.f32 %v2479_v49, %v2485_v17 }
 0x183   :  { %737 = vmatmul.bf16.gmra.mxu2 %v528_v33  ;;  %806 = vmatmul.bf16.gmra.mxu3 %v521_v29  ;;  %v874_v52 = vpack.c.bf16 %v843_v4, %v842_v36 }
 0x184   :  { %v408_v38 = vpop.f32.mrf.mxu1 }
 0x185   :  { %964 = vmatmul.bf16.vlgmr.msrb.gmra.mxu0 %v874_v52  ;;  %v409_v43 = vadd.f32 %v408_v38, %v2392_v56 }
 0x186   :  { %v767_v31 = vpop.f32.mrf.mxu3  ;;  %v2509_v3 = vpop.f32.mrf.mxu2 }
 0x187   :  { %v768_v47 = vadd.f32 %v767_v31, %v679_v40  ;;  %v479_v50 = vmax.f32 %v409_v43, 0.0  ;;  %v694_v43 = vadd.f32 %v2479_v49, %v2493_v37 }
 0x189   :  { %v844_v55 = vmax.f32 %v768_v47, 0.0 }
 0x18c   :  { %v410_v30 = vpop.f32.mrf.mxu1 }
 0x18d   :  { %v411_v48 = vadd.f32 %v410_v30, %v2392_v56  ;;  %v696_v30 = vadd.f32 %v2479_v49, %v2505_v41  ;;  %v699_v41 = vadd.f32 %v2479_v49, %v2509_v3 }
 0x18e   :  { %v769_v28 = vpop.f32.mrf.mxu3  ;;  %v700_v46 = vpop.f32.mrf.mxu2 }
 0x18f   :  { %v481_v62 = vmax.f32 %v411_v48, 0.0  ;;  %v770_v42 = vadd.f32 %v769_v28, %v681_v14  ;;  %v701_v2 = vadd.f32 %v2479_v49, %v700_v46 }
 0x191   :  { %v523_v59 = vpack.c.bf16 %v481_v62, %v479_v50  ;;  %v845_v18 = vmax.f32 %v770_v42, 0.0 }
 0x193   :  { %742 = vmatmul.bf16.gmra.mxu2 %v530_v61  ;;  %811 = vmatmul.bf16.gmra.mxu3 %v523_v59  ;;  %v875_v0 = vpack.c.bf16 %v845_v18, %v844_v55 }
 0x194   :  { %v413_v1 = vpop.f32.mrf.mxu1 }
 0x195   :  { %969 = vmatmul.bf16.gmra.mxu0 %v875_v0  ;;  %v414_v44 = vadd.f32 %v413_v1, %v2392_v56 }
 0x196   :  { %v772_v32 = vpop.f32.mrf.mxu3  ;;  %v703_v16 = vpop.f32.mrf.mxu2 }
 0x197   :  { %v773_v34 = vadd.f32 %v772_v32, %v684_v7  ;;  %v483_v15 = vmax.f32 %v414_v44, 0.0 }
 0x199   :  { %v846_v20 = vmax.f32 %v773_v34, 0.0 }
 0x19c   :  { %v415_v24 = vpop.f32.mrf.mxu1 }
 0x19d   :  { %v416_v51 = vadd.f32 %v415_v24, %v2392_v56 }
 0x19e   :  { %v774_v60 = vpop.f32.mrf.mxu3  ;;  %v705_v39 = vpop.f32.mrf.mxu2 }
 0x19f   :  { %v485_v57 = vmax.f32 %v416_v51, 0.0  ;;  %v775_v19 = vadd.f32 %v774_v60, %v686_v10 }
 0x1a1   :  { %v525_v35 = vpack.c.bf16 %v485_v57, %v483_v15  ;;  %v847_v54 = vmax.f32 %v775_v19, 0.0  ;;  %v704_v19 = vadd.f32 %v2479_v49, %v703_v16 }
 0x1a3   :  { %747 = vmatmul.bf16.gmra.mxu2 %v532_v21  ;;  %816 = vmatmul.bf16.gmra.mxu3 %v525_v35  ;;  %v876_v58 = vpack.c.bf16 %v847_v54, %v846_v20  ;;  %v706_v54 = vadd.f32 %v2479_v49, %v705_v39 }
 0x1a4   :  { %v418_v22 = vpop.f32.mrf.mxu1 }
 0x1a5   :  { %974 = vmatmul.bf16.gmra.mxu0 %v876_v58  ;;  %v419_v25 = vadd.f32 %v418_v22, %v2392_v56 }
 0x1a6   :  { %v777_v23 = vpop.f32.mrf.mxu3  ;;  %v708_v62 = vpop.f32.mrf.mxu2 }
 0x1a7   :  { %v778_v13 = vadd.f32 %v777_v23, %v689_v63  ;;  %v487_v29 = vmax.f32 %v419_v25, 0.0 }
 0x1a9   :  { %v848_v52 = vmax.f32 %v778_v13, 0.0 }
 0x1ac   :  { %v420_v5 = vpop.f32.mrf.mxu1 }
 0x1ad   :  { %v421_v12 = vadd.f32 %v420_v5, %v2392_v56 }
 0x1ae   :  { %v779_v36 = vpop.f32.mrf.mxu3  ;;  %v710_v0 = vpop.f32.mrf.mxu2 }
 0x1af   :  { %v489_v4 = vmax.f32 %v421_v12, 0.0  ;;  %v780_v33 = vadd.f32 %v779_v36, %v691_v26 }
 0x1b1   :  { %v527_v38 = vpack.c.bf16 %v489_v4, %v487_v29  ;;  %v849_v31 = vmax.f32 %v780_v33, 0.0  ;;  %v709_v29 = vadd.f32 %v2479_v49, %v708_v62  ;;  %v711_v4 = vadd.f32 %v2479_v49, %v710_v0 }
 0x1b3   :  { %821 = vmatmul.bf16.gmra.mxu3 %v527_v38  ;;  %v877_v53 = vpack.c.bf16 %v849_v31, %v848_v52 }
 0x1b4   :  { %v423_v9 = vpop.f32.mrf.mxu1 }
 0x1b5   :  { %979 = vmatmul.bf16.gmra.mxu0 %v877_v53  ;;  %v424_v17 = vadd.f32 %v423_v9, %v2392_v56 }
 0x1b6   :  { %v782_v40 = vpop.f32.mrf.mxu3  ;;  %v713_v15 = vpop.f32.mrf.mxu2 }
 0x1b7   :  { %v783_v14 = vadd.f32 %v782_v40, %v694_v43  ;;  %v491_v48 = vmax.f32 %v424_v17, 0.0  ;;  %v714_v40 = vadd.f32 %v2479_v49, %v713_v15 }
 0x1b9   :  { %v850_v42 = vmax.f32 %v783_v14, 0.0 }
 0x1bc   :  { %v425_v45 = vpop.f32.mrf.mxu1 }
 0x1bd   :  { %v426_v27 = vadd.f32 %v425_v45, %v2392_v56 }
 0x1be   :  { %v784_v47 = vpop.f32.mrf.mxu3  ;;  %v715_v58 = vpop.f32.mrf.mxu2 }
 0x1bf   :  { %v493_v28 = vmax.f32 %v426_v27, 0.0  ;;  %v785_v50 = vadd.f32 %v784_v47, %v696_v30  ;;  %v716_v17 = vadd.f32 %v2479_v49, %v715_v58  ;;  %v2547_v27 = vld [vmem:[%s2963_s2 + $0x2] ss:$0 sm:$0xff] }
 0x1c1   :  { %v529_v55 = vpack.c.bf16 %v493_v28, %v491_v48  ;;  %v851_v59 = vmax.f32 %v785_v50, 0.0 }
 0x1c3   :  { %826 = vmatmul.bf16.gmra.mxu3 %v529_v55  ;;  %v878_v18 = vpack.c.bf16 %v851_v59, %v850_v42 }
 0x1c4   :  { %v428_v37 = vpop.f32.mrf.mxu1 }
 0x1c5   :  { %984 = vmatmul.bf16.gmra.mxu0 %v878_v18  ;;  %v429_v1 = vadd.f32 %v428_v37, %v2392_v56 }
 0x1c6   :  { %v787_v61 = vpop.f32.mrf.mxu3  ;;  %v718_v36 = vpop.f32.mrf.mxu2 }
 0x1c7   :  { %v788_v6 = vadd.f32 %v787_v61, %v699_v41  ;;  %v495_v8 = vmax.f32 %v429_v1, 0.0  ;;  %v719_v18 = vadd.f32 %v2479_v49, %v718_v36 }
 0x1c9   :  { %v852_v11 = vmax.f32 %v788_v6, 0.0 }
 0x1cc   :  { %v430_v32 = vpop.f32.mrf.mxu1 }
 0x1cd   :  { %v431_v7 = vadd.f32 %v430_v32, %v2392_v56 }
 0x1ce   :  { %v789_v44 = vpop.f32.mrf.mxu3  ;;  %v720_v53 = vpop.f32.mrf.mxu2 }
 0x1cf   :  { %v497_v24 = vmax.f32 %v431_v7, 0.0  ;;  %v790_v10 = vadd.f32 %v789_v44, %v701_v2  ;;  %v721_v61 = vadd.f32 %v2479_v49, %v720_v53 }
 0x1d1   :  { %v531_v34 = vpack.c.bf16 %v497_v24, %v495_v8  ;;  %v853_v51 = vmax.f32 %v790_v10, 0.0 }
 0x1d3   :  { %831 = vmatmul.bf16.gmra.mxu3 %v531_v34  ;;  %v879_v60 = vpack.c.bf16 %v853_v51, %v852_v11 }
 0x1d4   :  { %v433_v57 = vpop.f32.mrf.mxu1 }
 0x1d5   :  { %989 = vmatmul.bf16.gmra.mxu0 %v879_v60  ;;  %v434_v20 = vadd.f32 %v433_v57, %v2392_v56 }
 0x1d6   :  { %v792_v3 = vpop.f32.mrf.mxu3  ;;  %v723_v43 = vpop.f32.mrf.mxu2 }
 0x1d7   :  { %v793_v21 = vadd.f32 %v792_v3, %v704_v19  ;;  %v499_v23 = vmax.f32 %v434_v20, 0.0  ;;  %v724_v34 = vadd.f32 %v2479_v49, %v723_v43 }
 0x1d9   :  { %v854_v5 = vmax.f32 %v793_v21, 0.0 }
 0x1dc   :  { %v435_v35 = vpop.f32.mrf.mxu1 }
 0x1dd   :  { %v436_v46 = vadd.f32 %v435_v35, %v2392_v56 }
 0x1de   :  { %v794_v22 = vpop.f32.mrf.mxu3  ;;  %v725_v42 = vpop.f32.mrf.mxu2 }
 0x1df   :  { %v501_v63 = vmax.f32 %v436_v46, 0.0  ;;  %v795_v25 = vadd.f32 %v794_v22, %v706_v54  ;;  %v726_v60 = vadd.f32 %v2479_v49, %v725_v42 }
 0x1e1   :  { %v533_v26 = vpack.c.bf16 %v501_v63, %v499_v23  ;;  %v855_v13 = vmax.f32 %v795_v25, 0.0 }
 0x1e3   :  { %836 = vmatmul.bf16.gmra.mxu3 %v533_v26  ;;  %v880_v12 = vpack.c.bf16 %v855_v13, %v854_v5 }
 0x1e5   :  { %994 = vmatmul.bf16.gmra.mxu0 %v880_v12 }
 0x1e6   :  { %v797_v16 = vpop.f32.mrf.mxu3  ;;  %v728_v32 = vpop.f32.mrf.mxu2 }
 0x1e7   :  { %v798_v33 = vadd.f32 %v797_v16, %v709_v29  ;;  %v729_v23 = vadd.f32 %v2479_v49, %v728_v32 }
 0x1e9   :  { %v856_v38 = vmax.f32 %v798_v33, 0.0 }
 0x1ee   :  { %v799_v52 = vpop.f32.mrf.mxu3  ;;  %v730_v10 = vpop.f32.mrf.mxu2 }
 0x1ef   :  { %v800_v56 = vadd.f32 %v799_v52, %v711_v4  ;;  %v731_v25 = vadd.f32 %v2479_v49, %v730_v10 }
 0x1f1   :  { %v857_v31 = vmax.f32 %v800_v56, 0.0 }
 0x1f3   :  { %v881_v9 = vpack.c.bf16 %v857_v31, %v856_v38 }
 0x1f5   :  { %999 = vmatmul.bf16.gmra.mxu0 %v881_v9 }
 0x1f6   :  { %v802_v39 = vpop.f32.mrf.mxu3  ;;  %v733_v46 = vpop.f32.mrf.mxu2 }
 0x1f7   :  { %v803_v45 = vadd.f32 %v802_v39, %v714_v40  ;;  %v734_v31 = vadd.f32 %v2479_v49, %v733_v46 }
 0x1f9   :  { %v858_v47 = vmax.f32 %v803_v45, 0.0 }
 0x1fe   :  { %v804_v30 = vpop.f32.mrf.mxu3  ;;  %v735_v26 = vpop.f32.mrf.mxu2 }
 0x1ff   :  { %v805_v14 = vadd.f32 %v804_v30, %v716_v17  ;;  %v736_v9 = vadd.f32 %v2479_v49, %v735_v26 }
 0x201   :  { %v859_v48 = vmax.f32 %v805_v14, 0.0 }
 0x202   :  { %v965_v28 = vpop.f32.mrf.mxu0 }
 0x203   :  { %v882_v50 = vpack.c.bf16 %v859_v48, %v858_v47  ;;  %v2550_v62 = vadd.f32 %v2547_v27, %v965_v28 }
 0x205   :  { %1004 = vmatmul.bf16.gmra.mxu0 %v882_v50  ;;  %1045 = vmax.xlane.f32.xlu0 %v2550_v62 }
 0x206   :  { %v807_v55 = vpop.f32.mrf.mxu3  ;;  %v738_v56 = vpop.f32.mrf.mxu2 }
 0x207   :  { %v808_v0 = vadd.f32 %v807_v55, %v719_v18  ;;  %v739_v42 = vadd.f32 %v2479_v49, %v738_v56 }
 0x209   :  { %v860_v2 = vmax.f32 %v808_v0, 0.0 }
 0x20a   :  { %v967_v59 = vpop.f32.mrf.mxu0 }
 0x20b   :  { %v2555_v37 = vadd.f32 %v2547_v27, %v967_v59 }
 0x20d   :  { %1047 = vmax.xlane.f32.xlu0 %v2555_v37 }
 0x20e   :  { %v809_v41 = vpop.f32.mrf.mxu3  ;;  %v740_v30 = vpop.f32.mrf.mxu2 }
 0x20f   :  { %v810_v1 = vadd.f32 %v809_v41, %v721_v61  ;;  %v741_v18 = vadd.f32 %v2479_v49, %v740_v30 }
 0x211   :  { %v861_v6 = vmax.f32 %v810_v1, 0.0 }
 0x212   :  { %v970_v7 = vpop.f32.mrf.mxu0 }
 0x213   :  { %v883_v44 = vpack.c.bf16 %v861_v6, %v860_v2  ;;  %v2560_v8 = vadd.f32 %v2547_v27, %v970_v7 }
 0x215   :  { %1009 = vmatmul.bf16.gmra.mxu0 %v883_v44  ;;  %1049 = vmax.xlane.f32.xlu1 %v2560_v8 }
 0x216   :  { %v812_v24 = vpop.f32.mrf.mxu3  ;;  %v743_v59 = vpop.f32.mrf.mxu2 }
 0x217   :  { %v813_v15 = vadd.f32 %v812_v24, %v724_v34 }
 0x219   :  { %v862_v19 = vmax.f32 %v813_v15, 0.0 }
 0x21a   :  { %v972_v11 = vpop.f32.mrf.mxu0 }
 0x21b   :  { %v2565_v51 = vadd.f32 %v2547_v27, %v972_v11  ;;  %v744_v11 = vadd.f32 %v2479_v49, %v743_v59 }
 0x21d   :  { %1051 = vmax.xlane.f32.xlu1 %v2565_v51 }
 0x21e   :  { %v814_v57 = vpop.f32.mrf.mxu3  ;;  %v745_v44 = vpop.f32.mrf.mxu2 }
 0x21f   :  { %v815_v3 = vadd.f32 %v814_v57, %v726_v60  ;;  %v746_v60 = vadd.f32 %v2479_v49, %v745_v44 }
 0x221   :  { %v863_v20 = vmax.f32 %v815_v3, 0.0 }
 0x222   :  { %v975_v35 = vpop.f32.mrf.mxu0 }
 0x223   :  { %v884_v54 = vpack.c.bf16 %v863_v20, %v862_v19  ;;  %v2570_v21 = vadd.f32 %v2547_v27, %v975_v35 }
 0x225   :  { %1014 = vmatmul.bf16.gmra.mxu0 %v884_v54  ;;  %1053 = vmax.xlane.f32.xlu2 %v2570_v21 }
 0x226   :  { %v817_v58 = vpop.f32.mrf.mxu3  ;;  %v748_v19 = vpop.f32.mrf.mxu2 }
 0x227   :  { %v818_v5 = vadd.f32 %v817_v58, %v729_v23 }
 0x229   :  { %v864_v16 = vmax.f32 %v818_v5, 0.0  ;;  %v749_v5 = vadd.f32 %v2479_v49, %v748_v19 }
 0x22a   :  { %v977_v22 = vpop.f32.mrf.mxu0 }
 0x22b   :  { %v2575_v63 = vadd.f32 %v2547_v27, %v977_v22 }
 0x22d   :  { %1055 = vmax.xlane.f32.xlu2 %v2575_v63 }
 0x22e   :  { %v819_v13 = vpop.f32.mrf.mxu3  ;;  %v750_v23 = vpop.f32.mrf.mxu2 }
 0x22f   :  { %v820_v12 = vadd.f32 %v819_v13, %v731_v25  ;;  %v751_v13 = vadd.f32 %v2479_v49, %v750_v23 }
 0x231   :  { %v865_v36 = vmax.f32 %v820_v12, 0.0 }
 0x232   :  { %v980_v29 = vpop.f32.mrf.mxu0 }
 0x233   :  { %v885_v4 = vpack.c.bf16 %v865_v36, %v864_v16  ;;  %v2580_v33 = vadd.f32 %v2547_v27, %v980_v29 }
 0x235   :  { %1019 = vmatmul.bf16.gmra.mxu0 %v885_v4  ;;  %1057 = vmax.xlane.f32.xlu0 %v2580_v33 }
 0x236   :  { %v822_v52 = vpop.f32.mrf.mxu3 }
 0x237   :  { %v823_v39 = vadd.f32 %v822_v52, %v734_v31 }
 0x239   :  { %v866_v17 = vmax.f32 %v823_v39, 0.0 }
 0x23a   :  { %v982_v38 = vpop.f32.mrf.mxu0 }
 0x23b   :  { %v2585_v53 = vadd.f32 %v2547_v27, %v982_v38 }
 0x23d   :  { %1059 = vmax.xlane.f32.xlu1 %v2585_v53 }
 0x23e   :  { %v824_v40 = vpop.f32.mrf.mxu3 }
 0x23f   :  { %v825_v43 = vadd.f32 %v824_v40, %v736_v9 }
 0x241   :  { %v867_v45 = vmax.f32 %v825_v43, 0.0 }
 0x242   :  { %v985_v14 = vpop.f32.mrf.mxu0 }
 0x243   :  { %v886_v47 = vpack.c.bf16 %v867_v45, %v866_v17  ;;  %v2590_v48 = vadd.f32 %v2547_v27, %v985_v14 }
 0x245   :  { %1024 = vmatmul.bf16.gmra.mxu0 %v886_v47  ;;  %1061 = vmax.xlane.f32.xlu2 %v2590_v48 }
 0x246   :  { %v827_v28 = vpop.f32.mrf.mxu3 }
 0x247   :  { %v828_v61 = vadd.f32 %v827_v28, %v739_v42 }
 0x249   :  { %v868_v1 = vmax.f32 %v828_v61, 0.0 }
 0x24a   :  { %v987_v50 = vpop.f32.mrf.mxu0 }
 0x24b   :  { %v2595_v55 = vadd.f32 %v2547_v27, %v987_v50 }
 0x24d   :  { %1063 = vmax.xlane.f32.xlu0 %v2595_v55 }
 0x24e   :  { %v829_v0 = vpop.f32.mrf.mxu3 }
 0x24f   :  { %v830_v41 = vadd.f32 %v829_v0, %v741_v18 }
 0x251   :  { %v869_v32 = vmax.f32 %v830_v41, 0.0 }
 0x252   :  { %v990_v2 = vpop.f32.mrf.mxu0 }
 0x253   :  { %v887_v6 = vpack.c.bf16 %v869_v32, %v868_v1  ;;  %v2600_v7 = vadd.f32 %v2547_v27, %v990_v2 }
 0x255   :  { %1029 = vmatmul.bf16.gmra.mxu0 %v887_v6  ;;  %1065 = vmax.xlane.f32.xlu1 %v2600_v7 }
 0x256   :  { %v832_v24 = vpop.f32.mrf.mxu3 }
 0x257   :  { %v833_v15 = vadd.f32 %v832_v24, %v744_v11 }
 0x259   :  { %v870_v20 = vmax.f32 %v833_v15, 0.0 }
 0x25a   :  { %v992_v10 = vpop.f32.mrf.mxu0 }
 0x25b   :  { %v2605_v34 = vadd.f32 %v2547_v27, %v992_v10 }
 0x25d   :  { %1067 = vmax.xlane.f32.xlu2 %v2605_v34 }
 0x25e   :  { %v834_v57 = vpop.f32.mrf.mxu3 }
 0x25f   :  { %v835_v3 = vadd.f32 %v834_v57, %v746_v60 }
 0x261   :  { %v871_v35 = vmax.f32 %v835_v3, 0.0 }
 0x262   :  { %v995_v54 = vpop.f32.mrf.mxu0 }
 0x263   :  { %v888_v46 = vpack.c.bf16 %v871_v35, %v870_v20  ;;  %v2610_v58 = vadd.f32 %v2547_v27, %v995_v54 }
 0x265   :  { %1034 = vmatmul.bf16.gmra.mxu0 %v888_v46  ;;  %1069 = vmax.xlane.f32.xlu0 %v2610_v58 }
 0x266   :  { %v837_v22 = vpop.f32.mrf.mxu3 }
 0x267   :  { %v838_v12 = vadd.f32 %v837_v22, %v749_v5 }
 0x269   :  { %v872_v29 = vmax.f32 %v838_v12, 0.0 }
 0x26a   :  { %v997_v25 = vpop.f32.mrf.mxu0 }
 0x26b   :  { %v2615_v26 = vadd.f32 %v2547_v27, %v997_v25 }
 0x26d   :  { %1071 = vmax.xlane.f32.xlu1 %v2615_v26 }
 0x26e   :  { %v839_v16 = vpop.f32.mrf.mxu3 }
 0x26f   :  { %v840_v36 = vadd.f32 %v839_v16, %v751_v13 }
 0x271   :  { %v873_v4 = vmax.f32 %v840_v36, 0.0 }
 0x272   :  { %v1000_v52 = vpop.f32.mrf.mxu0 }
 0x273   :  { %v889_v56 = vpack.c.bf16 %v873_v4, %v872_v29  ;;  %v2620_v38 = vadd.f32 %v2547_v27, %v1000_v52 }
 0x275   :  { %1039 = vmatmul.bf16.gmra.mxu0 %v889_v56  ;;  %1073 = vmax.xlane.f32.xlu2 %v2620_v38 }
 0x278   :  { %v1046_v31 = vpop.xlane.xlu0 %1045 }
 0x279   :  { %v1109_v9 = vsub.f32 %v2550_v62, %v1046_v31 }
 0x27a   :  { %v1002_v39 = vpop.f32.mrf.mxu0 }
 0x27b   :  { %v1141_v49 = vmul.f32 1.442695, %v1109_v9  ;;  %v2625_v40 = vadd.f32 %v2547_v27, %v1002_v39 }
 0x27d   :  { %2095 = vpow2.f32 %v1141_v49  ;;  %1075 = vmax.xlane.f32.xlu0 %v2625_v40 }
 0x280   :  { %v1048_v43 = vpop.xlane.xlu0 %1047 }
 0x281   :  { %v1110_v17 = vsub.f32 %v2555_v37, %v1048_v43 }
 0x282   :  { %v1005_v45 = vpop.f32.mrf.mxu0 }
 0x283   :  { %v2629_v30 = vpop.eup %2095  ;;  %v1143_v14 = vmul.f32 1.442695, %v1110_v17  ;;  %v2632_v47 = vadd.f32 %v2547_v27, %v1005_v45 }
 0x284   :  { %1205 = vadd.xlane.f32.xlu2 %v2629_v30 }
 0x285   :  { %2097 = vpow2.f32 %v1143_v14  ;;  %1077 = vmax.xlane.f32.xlu1 %v2632_v47 }
 0x288   :  { %v1050_v62 = vpop.xlane.xlu1 %1049 }
 0x289   :  { %v1111_v28 = vsub.f32 %v2560_v8, %v1050_v62 }
 0x28a   :  { %v1007_v50 = vpop.f32.mrf.mxu0 }
 0x28b   :  { %v2637_v42 = vpop.eup %2097  ;;  %v1145_v59 = vmul.f32 1.442695, %v1111_v28  ;;  %v2640_v37 = vadd.f32 %v2547_v27, %v1007_v50 }
 0x28c   :  { %1207 = vadd.xlane.f32.xlu0 %v2637_v42 }
 0x28d   :  { %2099 = vpow2.f32 %v1145_v59  ;;  %1079 = vmax.xlane.f32.xlu2 %v2640_v37 }
 0x290   :  { %v1052_v18 = vpop.xlane.xlu1 %1051 }
 0x291   :  { %v1112_v61 = vsub.f32 %v2565_v51, %v1052_v18 }
 0x292   :  { %v1010_v0 = vpop.f32.mrf.mxu0 }
 0x293   :  { %v2645_v41 = vpop.eup %2099  ;;  %v1147_v1 = vmul.f32 1.442695, %v1112_v61  ;;  %v2648_v8 = vadd.f32 %v2547_v27, %v1010_v0 }
 0x294   :  { %1209 = vadd.xlane.f32.xlu1 %v2645_v41 }
 0x295   :  { %2101 = vpow2.f32 %v1147_v1  ;;  %1081 = vmax.xlane.f32.xlu0 %v2648_v8 }
 0x298   :  { %v1054_v32 = vpop.xlane.xlu2 %1053 }
 0x299   :  { %v1113_v2 = vsub.f32 %v2570_v21, %v1054_v32 }
 0x29a   :  { %v1012_v6 = vpop.f32.mrf.mxu0 }
 0x29b   :  { %v2653_v44 = vpop.eup %2101  ;;  %v1149_v24 = vmul.f32 1.442695, %v1113_v2  ;;  %v2656_v51 = vadd.f32 %v2547_v27, %v1012_v6 }
 0x29c   :  { %1211 = vadd.xlane.f32.xlu2 %v2653_v44 }
 0x29d   :  { %2103 = vpow2.f32 %v1149_v24  ;;  %1083 = vmax.xlane.f32.xlu1 %v2656_v51 }
 0x2a0   :  { %v1056_v10 = vpop.xlane.xlu2 %1055 }
 0x2a1   :  { %v1114_v11 = vsub.f32 %v2575_v63, %v1056_v10 }
 0x2a2   :  { %v1015_v60 = vpop.f32.mrf.mxu0 }
 0x2a3   :  { %v2661_v15 = vpop.eup %2103  ;;  %v1151_v57 = vmul.f32 1.442695, %v1114_v11  ;;  %v2664_v21 = vadd.f32 %v2547_v27, %v1015_v60 }
 0x2a4   :  { %1213 = vadd.xlane.f32.xlu0 %v2661_v15 }
 0x2a5   :  { %2105 = vpow2.f32 %v1151_v57  ;;  %1085 = vmax.xlane.f32.xlu2 %v2664_v21 }
 0x2a8   :  { %v1058_v3 = vpop.xlane.xlu0 %1057 }
 0x2a9   :  { %v1115_v19 = vsub.f32 %v2580_v33, %v1058_v3 }
 0x2aa   :  { %v1017_v20 = vpop.f32.mrf.mxu0 }
 0x2ab   :  { %v2669_v35 = vpop.eup %2105  ;;  %v1153_v54 = vmul.f32 1.442695, %v1115_v19  ;;  %v2672_v63 = vadd.f32 %v2547_v27, %v1017_v20 }
 0x2ac   :  { %1215 = vadd.xlane.f32.xlu1 %v2669_v35 }
 0x2ad   :  { %2107 = vpow2.f32 %v1153_v54  ;;  %1087 = vmax.xlane.f32.xlu0 %v2672_v63 }
 0x2b0   :  { %v1060_v46 = vpop.xlane.xlu1 %1059 }
 0x2b1   :  { %v1116_v22 = vsub.f32 %v2585_v53, %v1060_v46 }
 0x2b2   :  { %v1020_v23 = vpop.f32.mrf.mxu0 }
 0x2b3   :  { %v2677_v25 = vpop.eup %2107  ;;  %v1155_v5 = vmul.f32 1.442695, %v1116_v22  ;;  %v2680_v33 = vadd.f32 %v2547_v27, %v1020_v23 }
 0x2b4   :  { %1217 = vadd.xlane.f32.xlu2 %v2677_v25 }
 0x2b5   :  { %2109 = vpow2.f32 %v1155_v5  ;;  %1089 = vmax.xlane.f32.xlu1 %v2680_v33 }
 0x2b8   :  { %v1062_v13 = vpop.xlane.xlu2 %1061 }
 0x2b9   :  { %v1117_v12 = vsub.f32 %v2590_v48, %v1062_v13 }
 0x2ba   :  { %v1022_v16 = vpop.f32.mrf.mxu0 }
 0x2bb   :  { %v2685_v36 = vpop.eup %2109  ;;  %v1157_v29 = vmul.f32 1.442695, %v1117_v12  ;;  %v2688_v53 = vadd.f32 %v2547_v27, %v1022_v16 }
 0x2bc   :  { %1219 = vadd.xlane.f32.xlu0 %v2685_v36 }
 0x2bd   :  { %2111 = vpow2.f32 %v1157_v29  ;;  %1091 = vmax.xlane.f32.xlu2 %v2688_v53 }
 0x2c0   :  { %v1064_v4 = vpop.xlane.xlu0 %1063 }
 0x2c1   :  { %v1118_v52 = vsub.f32 %v2595_v55, %v1064_v4 }
 0x2c2   :  { %v1025_v56 = vpop.f32.mrf.mxu0 }
 0x2c3   :  { %v2693_v31 = vpop.eup %2111  ;;  %v1159_v9 = vmul.f32 1.442695, %v1118_v52  ;;  %v2696_v48 = vadd.f32 %v2547_v27, %v1025_v56 }
 0x2c4   :  { %1221 = vadd.xlane.f32.xlu1 %v2693_v31 }
 0x2c5   :  { %2113 = vpow2.f32 %v1159_v9  ;;  %1093 = vmax.xlane.f32.xlu0 %v2696_v48 }
 0x2c8   :  { %v1066_v39 = vpop.xlane.xlu1 %1065 }
 0x2c9   :  { %v1119_v49 = vsub.f32 %v2600_v7, %v1066_v39 }
 0x2ca   :  { %v1027_v43 = vpop.f32.mrf.mxu0 }
 0x2cb   :  { %v2701_v17 = vpop.eup %2113  ;;  %v1161_v45 = vmul.f32 1.442695, %v1119_v49  ;;  %v2704_v55 = vadd.f32 %v2547_v27, %v1027_v43 }
 0x2cc   :  { %1223 = vadd.xlane.f32.xlu2 %v2701_v17 }
 0x2cd   :  { %2115 = vpow2.f32 %v1161_v45  ;;  %1095 = vmax.xlane.f32.xlu1 %v2704_v55 }
 0x2d0   :  { %v1068_v1 = vpop.xlane.xlu2 %1067 }
 0x2d1   :  { %v1120_v46 = vsub.f32 %v2605_v34, %v1068_v1 }
 0x2d2   :  { %v1030_v14 = vpop.f32.mrf.mxu0 }
 0x2d3   :  { %v2708_v62 = vpop.eup %2115  ;;  %v2711_v28 = vadd.f32 %v2547_v27, %v1030_v14  ;;  %v1163_v23 = vmul.f32 1.442695, %v1120_v46 }
 0x2d4   :  { %1225 = vadd.xlane.f32.xlu0 %v2708_v62 }
 0x2d5   :  { %1097 = vmax.xlane.f32.xlu2 %v2711_v28 }
 0x2d8   :  { %v1070_v18 = vpop.xlane.xlu0 %1069 }
 0x2d9   :  { %v1121_v0 = vsub.f32 %v2610_v58, %v1070_v18 }
 0x2da   :  { %v1032_v7 = vpop.f32.mrf.mxu0 }
 0x2db   :  { %v2716_v50 = vadd.f32 %v2547_v27, %v1032_v7  ;;  %v1165_v32 = vmul.f32 1.442695, %v1121_v0 }
 0x2dd   :  { %1099 = vmax.xlane.f32.xlu0 %v2716_v50  ;;  %2117 = vpow2.f32 %v1165_v32 }
 0x2e0   :  { %v1072_v6 = vpop.xlane.xlu1 %1071 }
 0x2e1   :  { %v1122_v10 = vsub.f32 %v2615_v26, %v1072_v6 }
 0x2e2   :  { %v1035_v59 = vpop.f32.mrf.mxu0 }
 0x2e3   :  { %v2720_v61 = vadd.f32 %v2547_v27, %v1035_v59  ;;  %v1167_v3 = vmul.f32 1.442695, %v1122_v10  ;;  %v2733_v54 = vpop.eup %2117 }
 0x2e5   :  { %1101 = vmax.xlane.f32.xlu1 %v2720_v61 }
 0x2e8   :  { %v1074_v11 = vpop.xlane.xlu2 %1073 }
 0x2e9   :  { %v1123_v4 = vsub.f32 %v2620_v38, %v1074_v11 }
 0x2ea   :  { %v1037_v2 = vpop.f32.mrf.mxu0 }
 0x2eb   :  { %v2725_v24 = vadd.f32 %v2547_v27, %v1037_v2  ;;  %v1169_v9 = vmul.f32 1.442695, %v1123_v4 }
 0x2ed   :  { %1103 = vmax.xlane.f32.xlu2 %v2725_v24 }
 0x2f0   :  { %v1076_v60 = vpop.xlane.xlu0 %1075 }
 0x2f1   :  { %v1124_v57 = vsub.f32 %v2625_v40, %v1076_v60 }
 0x2f2   :  { %v1040_v19 = vpop.f32.mrf.mxu0 }
 0x2f3   :  { %v1171_v20 = vmul.f32 1.442695, %v1124_v57  ;;  %v2731_v58 = vadd.f32 %v2547_v27, %v1040_v19 }
 0x2f5   :  { %2119 = vpow2.f32 %v1171_v20  ;;  %1105 = vmax.xlane.f32.xlu0 %v2731_v58  ;;  %1229 = vadd.xlane.f32.xlu2 %v2733_v54 }
 0x2f6   :  { %2121 = vpow2.f32 %v1167_v3 }
 0x2f7   :  { %v1206_v26 = vpop.xlane.xlu2 %1205 }
 0x2f8   :  { %2123 = vrcp.f32 %v1206_v26  ;;  %v1078_v22 = vpop.xlane.xlu1 %1077  ;;  %v1278_v43 = vand.u32 2147483647, %v1206_v26  ;;  %vm1274_vm1 = vweird.f32 %v1206_v26 }
 0x2f9   :  { %v1125_v40 = vsub.f32 %v2632_v47, %v1078_v22 }
 0x2fa   :  { %v1042_v5 = vpop.f32.mrf.mxu0  ;;  %vm1279_vm3 = vcmp.eq.f32.partialorder %v1278_v43, 8.507059e+37 }
 0x2fb   :  { %v2739_v13 = vpop.eup %2119  ;;  %v1173_v12 = vmul.f32 1.442695, %v1125_v40  ;;  %v2742_v16 = vadd.f32 %v2547_v27, %v1042_v5  ;;  %v1280_v27 = vand.u32 2147483648, %v1206_v26 }
 0x2fc   :  { %v2744_v29 = vpop.eup %2121 }
 0x2fd   :  { %2125 = vpow2.f32 %v1173_v12  ;;  %1107 = vmax.xlane.f32.xlu1 %v2742_v16  ;;  %1231 = vadd.xlane.f32.xlu0 %v2744_v29  ;;  %v1281_v59 = vor.u32 1.1754944e-38, %v1280_v27 }
 0x2fe   :  { %v2124_v34 = vpop.eup %2123  ;;  %2127 = vpow2.f32 %v1163_v23  ;;  %1235 = vadd.xlane.f32.xlu2 %v2739_v13 }
 0x2ff   :  { %v1270_v47 = vmul.f32 %v2124_v34, %v1206_v26  ;;  %v1208_v52 = vpop.xlane.xlu0 %1207  ;;  %vm1275_vm0 = vweird.f32 %v2124_v34 }
 0x300   :  { %2129 = vrcp.f32 %v1208_v52  ;;  %v1080_v45 = vpop.xlane.xlu2 %1079  ;;  %vm1276_vm2 = vmor %vm1274_vm1, %vm1275_vm0  ;;  %v1295_v57 = vand.u32 2147483648, %v1208_v52  ;;  %vm1289_vm5 = vweird.f32 %v1208_v52 }
 0x301   :  { %v1271_v56 = vsub.f32 1.0, %v1270_v47  ;;  %2131 = vpow2.f32 %v1169_v9  ;;  %v1126_v18 = vsub.f32 %v2640_v37, %v1080_v45  ;;  %v1293_v37 = vand.u32 2147483647, %v1208_v52 }
 0x303   :  { %v2750_v39 = vpop.eup %2125  ;;  %v1272_v49 = vmul.f32 %v2124_v34, %v1271_v56  ;;  %v1175_v3 = vmul.f32 1.442695, %v1126_v18  ;;  %vm1294_vm7 = vcmp.eq.f32.partialorder %v1293_v37, 8.507059e+37 }
 0x304   :  { %v2752_v14 = vpop.eup %2127 }
 0x305   :  { %v1273_v7 = vadd.f32 %v2124_v34, %v1272_v49  ;;  %1227 = vadd.xlane.f32.xlu1 %v2752_v14  ;;  %1237 = vadd.xlane.f32.xlu0 %v2750_v39 }
 0x306   :  { %v2130_v38 = vpop.eup %2129 }
 0x307   :  { %v1277_v0 = vsel %vm1276_vm2, %v2124_v34, %v1273_v7  ;;  %v1285_v1 = vmul.f32 %v2130_v38, %v1208_v52  ;;  %v1210_v32 = vpop.xlane.xlu1 %1209  ;;  %vm1290_vm4 = vweird.f32 %v2130_v38  ;;  %v2762_v46 = vpop.eup %2131 }
 0x308   :  { %v1282_v2 = vsel %vm1279_vm3, %v1281_v59, %v1277_v0  ;;  %2133 = vrcp.f32 %v1210_v32  ;;  %v1082_v6 = vpop.xlane.xlu0 %1081  ;;  %vm1291_vm6 = vmor %vm1289_vm5, %vm1290_vm4  ;;  %v1310_v52 = vand.u32 2147483648, %v1210_v32  ;;  %v1308_v27 = vand.u32 2147483647, %v1210_v32 }
 0x309   :  { %v1283_v10 = vmul.f32 %v2629_v30, %v1282_v2  ;;  %v1286_v11 = vsub.f32 1.0, %v1285_v1  ;;  %v1127_v60 = vsub.f32 %v2648_v8, %v1082_v6  ;;  %v1296_v8 = vor.u32 1.1754944e-38, %v1295_v57 }
 0x30a   :  { %vm1304_vm9 = vweird.f32 %v1210_v32  ;;  %vm1309_vm11 = vcmp.eq.f32.partialorder %v1308_v27, 8.507059e+37 }
 0x30b   :  { %1749 = vst [vmem:[%s2964_s3] sm:$0xff] %v1283_v10  ;;  %v1287_v19 = vmul.f32 %v2130_v38, %v1286_v11  ;;  %v1177_v20 = vmul.f32 1.442695, %v1127_v60 }
 0x30d   :  { %v1288_v26 = vadd.f32 %v2130_v38, %v1287_v19  ;;  %2135 = vpow2.f32 %v1177_v20  ;;  %1233 = vadd.xlane.f32.xlu1 %v2762_v46 }
 0x30e   :  { %v2134_v30 = vpop.eup %2133  ;;  %2137 = vpow2.f32 %v1175_v3 }
 0x30f   :  { %v1292_v22 = vsel %vm1291_vm6, %v2130_v38, %v1288_v26  ;;  %v1300_v40 = vmul.f32 %v2134_v30, %v1210_v32  ;;  %v1212_v23 = vpop.xlane.xlu2 %1211  ;;  %vm1305_vm8 = vweird.f32 %v2134_v30 }
 0x310   :  { %v1297_v5 = vsel %vm1294_vm7, %v1296_v8, %v1292_v22  ;;  %2139 = vrcp.f32 %v1212_v23  ;;  %v1084_v12 = vpop.xlane.xlu1 %1083  ;;  %vm1306_vm10 = vmor %vm1304_vm9, %vm1305_vm8  ;;  %v1325_v10 = vand.u32 2147483648, %v1212_v23  ;;  %v1323_v60 = vand.u32 2147483647, %v1212_v23 }
 0x311   :  { %v1298_v34 = vmul.f32 %v2637_v42, %v1297_v5  ;;  %v1301_v4 = vsub.f32 1.0, %v1300_v40  ;;  %v1128_v47 = vsub.f32 %v2656_v51, %v1084_v12  ;;  %v1311_v51 = vor.u32 1.1754944e-38, %v1310_v52 }
 0x312   :  { %vm1319_vm13 = vweird.f32 %v1212_v23  ;;  %v1326_v19 = vor.u32 1.1754944e-38, %v1325_v10  ;;  %vm1324_vm15 = vcmp.eq.f32.partialorder %v1323_v60, 8.507059e+37 }
 0x313   :  { %v2767_v56 = vpop.eup %2135  ;;  %1750 = vst [vmem:[%s2964_s3 + $0x8] sm:$0xff] %v1298_v34  ;;  %v1302_v9 = vmul.f32 %v2134_v30, %v1301_v4  ;;  %v1179_v49 = vmul.f32 1.442695, %v1128_v47 }
 0x314   :  { %v2772_v43 = vpop.eup %2137  ;;  %1241 = vadd.xlane.f32.xlu2 %v2767_v56 }
 0x315   :  { %v1303_v45 = vadd.f32 %v2134_v30, %v1302_v9  ;;  %2141 = vpow2.f32 %v1179_v49  ;;  %1239 = vadd.xlane.f32.xlu1 %v2772_v43 }
 0x316   :  { %v2140_v42 = vpop.eup %2139 }
 0x317   :  { %v1307_v7 = vsel %vm1306_vm10, %v2134_v30, %v1303_v45  ;;  %v1315_v38 = vmul.f32 %v2140_v42, %v1212_v23  ;;  %v1214_v59 = vpop.xlane.xlu0 %1213  ;;  %vm1320_vm12 = vweird.f32 %v2140_v42 }
 0x318   :  { %v1312_v18 = vsel %vm1309_vm11, %v1311_v51, %v1307_v7  ;;  %2143 = vrcp.f32 %v1214_v59  ;;  %v1086_v0 = vpop.xlane.xlu2 %1085  ;;  %vm1321_vm14 = vmor %vm1319_vm13, %vm1320_vm12  ;;  %v1340_v5 = vand.u32 2147483648, %v1214_v59  ;;  %v1338_v34 = vand.u32 2147483647, %v1214_v59 }
 0x319   :  { %v1313_v1 = vmul.f32 %v2645_v41, %v1312_v18  ;;  %v1316_v2 = vsub.f32 1.0, %v1315_v38  ;;  %v1129_v6 = vsub.f32 %v2664_v21, %v1086_v0  ;;  %vm1334_vm1 = vweird.f32 %v1214_v59 }
 0x31a   :  { %v1341_v52 = vor.u32 1.1754944e-38, %v1340_v5  ;;  %vm1339_vm3 = vcmp.eq.f32.partialorder %v1338_v34, 8.507059e+37 }
 0x31b   :  { %v2778_v32 = vpop.eup %2141  ;;  %1751 = vst [vmem:[%s2964_s3 + $0x10] sm:$0xff] %v1313_v1  ;;  %v1317_v11 = vmul.f32 %v2140_v42, %v1316_v2  ;;  %v1181_v57 = vmul.f32 1.442695, %v1129_v6 }
 0x31c   :  { %1243 = vadd.xlane.f32.xlu0 %v2778_v32 }
 0x31d   :  { %v1318_v3 = vadd.f32 %v2140_v42, %v1317_v11  ;;  %2145 = vpow2.f32 %v1181_v57 }
 0x31e   :  { %v2144_v41 = vpop.eup %2143 }
 0x31f   :  { %v1322_v21 = vsel %vm1321_vm14, %v2140_v42, %v1318_v3  ;;  %v1330_v37 = vmul.f32 %v2144_v41, %v1214_v59  ;;  %v1216_v20 = vpop.xlane.xlu1 %1215  ;;  %vm1335_vm0 = vweird.f32 %v2144_v41 }
 0x320   :  { %v1327_v26 = vsel %vm1324_vm15, %v1326_v19, %v1322_v21  ;;  %2147 = vrcp.f32 %v1216_v20  ;;  %v1088_v30 = vpop.xlane.xlu0 %1087  ;;  %vm1336_vm2 = vmor %vm1334_vm1, %vm1335_vm0  ;;  %v1355_v38 = vand.u32 2147483648, %v1216_v20  ;;  %v1353_v0 = vand.u32 2147483647, %v1216_v20 }
 0x321   :  { %v1328_v8 = vmul.f32 %v2653_v44, %v1327_v26  ;;  %v1331_v22 = vsub.f32 1.0, %v1330_v37  ;;  %v1130_v40 = vsub.f32 %v2672_v63, %v1088_v30  ;;  %vm1349_vm5 = vweird.f32 %v1216_v20 }
 0x322   :  { %v1356_v6 = vor.u32 1.1754944e-38, %v1355_v38  ;;  %vm1354_vm7 = vcmp.eq.f32.partialorder %v1353_v0, 8.507059e+37 }
 0x323   :  { %v2786_v12 = vpop.eup %2145  ;;  %1752 = vst [vmem:[%s2964_s3 + $0x18] sm:$0xff] %v1328_v8  ;;  %v1332_v23 = vmul.f32 %v2144_v41, %v1331_v22  ;;  %v1183_v4 = vmul.f32 1.442695, %v1130_v40 }
 0x324   :  { %1245 = vadd.xlane.f32.xlu1 %v2786_v12 }
 0x325   :  { %v1333_v47 = vadd.f32 %v2144_v41, %v1332_v23  ;;  %2149 = vpow2.f32 %v1183_v4 }
 0x326   :  { %v2148_v44 = vpop.eup %2147 }
 0x327   :  { %v1337_v63 = vsel %vm1336_vm2, %v2144_v41, %v1333_v47  ;;  %v1345_v9 = vmul.f32 %v2148_v44, %v1216_v20  ;;  %v1218_v27 = vpop.xlane.xlu2 %1217  ;;  %vm1350_vm4 = vweird.f32 %v2148_v44 }
 0x328   :  { %v1342_v49 = vsel %vm1339_vm3, %v1341_v52, %v1337_v63  ;;  %2151 = vrcp.f32 %v1218_v27  ;;  %v1090_v45 = vpop.xlane.xlu1 %1089  ;;  %vm1351_vm6 = vmor %vm1349_vm5, %vm1350_vm4  ;;  %v1370_v21 = vand.u32 2147483648, %v1218_v27  ;;  %v1368_v26 = vand.u32 2147483647, %v1218_v27 }
 0x329   :  { %v1343_v42 = vmul.f32 %v2661_v15, %v1342_v49  ;;  %v1346_v51 = vsub.f32 1.0, %v1345_v9  ;;  %v1131_v7 = vsub.f32 %v2680_v33, %v1090_v45  ;;  %vm1364_vm9 = vweird.f32 %v1218_v27 }
 0x32a   :  { %v1371_v22 = vor.u32 1.1754944e-38, %v1370_v21  ;;  %vm1369_vm11 = vcmp.eq.f32.partialorder %v1368_v26, 8.507059e+37 }
 0x32b   :  { %v2794_v18 = vpop.eup %2149  ;;  %1753 = vst [vmem:[%s2964_s3 + $0x20] sm:$0xff] %v1343_v42  ;;  %v1347_v59 = vmul.f32 %v2148_v44, %v1346_v51  ;;  %v1185_v1 = vmul.f32 1.442695, %v1131_v7 }
 0x32c   :  { %1247 = vadd.xlane.f32.xlu2 %v2794_v18 }
 0x32d   :  { %v1348_v2 = vadd.f32 %v2148_v44, %v1347_v59  ;;  %2153 = vpow2.f32 %v1185_v1 }
 0x32e   :  { %v2152_v15 = vpop.eup %2151 }
 0x32f   :  { %v1352_v33 = vsel %vm1351_vm6, %v2148_v44, %v1348_v2  ;;  %v1360_v10 = vmul.f32 %v2152_v15, %v1218_v27  ;;  %v1220_v11 = vpop.xlane.xlu0 %1219  ;;  %vm1365_vm8 = vweird.f32 %v2152_v15 }
 0x330   :  { %v1357_v60 = vsel %vm1354_vm7, %v1356_v6, %v1352_v33  ;;  %2155 = vrcp.f32 %v1220_v11  ;;  %v1092_v57 = vpop.xlane.xlu2 %1091  ;;  %vm1366_vm10 = vmor %vm1364_vm9, %vm1365_vm8  ;;  %v1385_v52 = vand.u32 2147483648, %v1220_v11  ;;  %v1383_v27 = vand.u32 2147483647, %v1220_v11 }
 0x331   :  { %v1358_v3 = vmul.f32 %v2669_v35, %v1357_v60  ;;  %v1361_v41 = vsub.f32 1.0, %v1360_v10  ;;  %v1132_v19 = vsub.f32 %v2688_v53, %v1092_v57  ;;  %vm1379_vm13 = vweird.f32 %v1220_v11 }
 0x332   :  { %v1386_v42 = vor.u32 1.1754944e-38, %v1385_v52  ;;  %vm1384_vm15 = vcmp.eq.f32.partialorder %v1383_v27, 8.507059e+37 }
 0x333   :  { %v2802_v37 = vpop.eup %2153  ;;  %1754 = vst [vmem:[%s2964_s3 + $0x28] sm:$0xff] %v1358_v3  ;;  %v1362_v20 = vmul.f32 %v2152_v15, %v1361_v41  ;;  %v1187_v30 = vmul.f32 1.442695, %v1132_v19 }
 0x334   :  { %1249 = vadd.xlane.f32.xlu0 %v2802_v37 }
 0x335   :  { %v1363_v8 = vadd.f32 %v2152_v15, %v1362_v20  ;;  %2157 = vpow2.f32 %v1187_v30 }
 0x336   :  { %v2156_v35 = vpop.eup %2155 }
 0x337   :  { %v1367_v53 = vsel %vm1366_vm10, %v2152_v15, %v1363_v8  ;;  %v1375_v40 = vmul.f32 %v2156_v35, %v1220_v11  ;;  %v1222_v5 = vpop.xlane.xlu1 %1221  ;;  %vm1380_vm12 = vweird.f32 %v2156_v35 }
 0x338   :  { %v1372_v23 = vsel %vm1369_vm11, %v1371_v22, %v1367_v53  ;;  %2159 = vrcp.f32 %v1222_v5  ;;  %v1094_v34 = vpop.xlane.xlu0 %1093  ;;  %vm1381_vm14 = vmor %vm1379_vm13, %vm1380_vm12  ;;  %v1400_v15 = vand.u32 2147483648, %v1222_v5  ;;  %v1398_v10 = vand.u32 2147483647, %v1222_v5 }
 0x339   :  { %v1373_v4 = vmul.f32 %v2677_v25, %v1372_v23  ;;  %v1376_v47 = vsub.f32 1.0, %v1375_v40  ;;  %v1133_v44 = vsub.f32 %v2696_v48, %v1094_v34  ;;  %vm1394_vm1 = vweird.f32 %v1222_v5 }
 0x33a   :  { %v1401_v57 = vor.u32 1.1754944e-38, %v1400_v15  ;;  %vm1399_vm3 = vcmp.eq.f32.partialorder %v1398_v10, 8.507059e+37 }
 0x33b   :  { %v2810_v63 = vpop.eup %2157  ;;  %1755 = vst [vmem:[%s2964_s3 + $0x30] sm:$0xff] %v1373_v4  ;;  %v1377_v9 = vmul.f32 %v2156_v35, %v1376_v47  ;;  %v1189_v49 = vmul.f32 1.442695, %v1133_v44 }
 0x33c   :  { %1251 = vadd.xlane.f32.xlu1 %v2810_v63 }
 0x33d   :  { %v1378_v45 = vadd.f32 %v2156_v35, %v1377_v9  ;;  %2161 = vpow2.f32 %v1189_v49 }
 0x33e   :  { %v2160_v25 = vpop.eup %2159 }
 0x33f   :  { %v1382_v48 = vsel %vm1381_vm14, %v2156_v35, %v1378_v45  ;;  %v1390_v51 = vmul.f32 %v2160_v25, %v1222_v5  ;;  %v1224_v7 = vpop.xlane.xlu2 %1223  ;;  %vm1395_vm0 = vweird.f32 %v2160_v25 }
 0x340   :  { %v1387_v38 = vsel %vm1384_vm15, %v1386_v42, %v1382_v48  ;;  %2163 = vrcp.f32 %v1224_v7  ;;  %v1096_v59 = vpop.xlane.xlu1 %1095  ;;  %vm1396_vm2 = vmor %vm1394_vm1, %vm1395_vm0  ;;  %v1415_v8 = vand.u32 2147483648, %v1224_v7  ;;  %v1413_v53 = vand.u32 2147483647, %v1224_v7 }
 0x341   :  { %v1388_v0 = vmul.f32 %v2685_v36, %v1387_v38  ;;  %v1391_v1 = vsub.f32 1.0, %v1390_v51  ;;  %v1134_v2 = vsub.f32 %v2704_v55, %v1096_v59  ;;  %vm1409_vm5 = vweird.f32 %v1224_v7 }
 0x342   :  { %v1416_v23 = vor.u32 1.1754944e-38, %v1415_v8  ;;  %vm1414_vm7 = vcmp.eq.f32.partialorder %v1413_v53, 8.507059e+37 }
 0x343   :  { %v2818_v6 = vpop.eup %2161  ;;  %1756 = vst [vmem:[%s2964_s3 + $0x38] sm:$0xff] %v1388_v0  ;;  %v1392_v33 = vmul.f32 %v2160_v25, %v1391_v1  ;;  %v1191_v11 = vmul.f32 1.442695, %v1134_v2 }
 0x344   :  { %1253 = vadd.xlane.f32.xlu2 %v2818_v6 }
 0x345   :  { %v1393_v60 = vadd.f32 %v2160_v25, %v1392_v33  ;;  %2165 = vpow2.f32 %v1191_v11 }
 0x346   :  { %v2164_v36 = vpop.eup %2163 }
 0x347   :  { %v1397_v55 = vsel %vm1396_vm2, %v2160_v25, %v1393_v60  ;;  %v1405_v3 = vmul.f32 %v2164_v36, %v1224_v7  ;;  %v1226_v41 = vpop.xlane.xlu0 %1225  ;;  %vm1410_vm4 = vweird.f32 %v2164_v36 }
 0x348   :  { %v1402_v19 = vsel %vm1399_vm3, %v1401_v57, %v1397_v55  ;;  %2167 = vrcp.f32 %v1226_v41  ;;  %v1098_v21 = vpop.xlane.xlu2 %1097  ;;  %vm1411_vm6 = vmor %vm1409_vm5, %vm1410_vm4  ;;  %v1430_v27 = vand.u32 2147483648, %v1226_v41  ;;  %v1428_v25 = vand.u32 2147483647, %v1226_v41 }
 0x349   :  { %v1403_v20 = vmul.f32 %v2693_v31, %v1402_v19  ;;  %v1406_v26 = vsub.f32 1.0, %v1405_v3  ;;  %v1135_v30 = vsub.f32 %v2711_v28, %v1098_v21  ;;  %vm1424_vm9 = vweird.f32 %v1226_v41 }
 0x34a   :  { %vm1429_vm11 = vcmp.eq.f32.partialorder %v1428_v25, 8.507059e+37 }
 0x34b   :  { %v2826_v35 = vpop.eup %2165  ;;  %1757 = vst [vmem:[%s2964_s3 + $0x40] sm:$0xff] %v1403_v20  ;;  %v1407_v22 = vmul.f32 %v2164_v36, %v1406_v26  ;;  %v1193_v40 = vmul.f32 1.442695, %v1135_v30 }
 0x34c   :  { %1255 = vadd.xlane.f32.xlu0 %v2826_v35 }
 0x34d   :  { %v1408_v5 = vadd.f32 %v2164_v36, %v1407_v22  ;;  %2169 = vpow2.f32 %v1193_v40 }
 0x34e   :  { %v2168_v31 = vpop.eup %2167 }
 0x34f   :  { %v1412_v28 = vsel %vm1411_vm6, %v2164_v36, %v1408_v5  ;;  %v1420_v34 = vmul.f32 %v2168_v31, %v1226_v41  ;;  %vm1425_vm8 = vweird.f32 %v2168_v31 }
 0x350   :  { %v1417_v4 = vsel %vm1414_vm7, %v1416_v23, %v1412_v28  ;;  %v1100_v47 = vpop.xlane.xlu0 %1099  ;;  %vm1426_vm10 = vmor %vm1424_vm9, %vm1425_vm8 }
 0x351   :  { %v1418_v44 = vmul.f32 %v2701_v17, %v1417_v4  ;;  %v1421_v52 = vsub.f32 1.0, %v1420_v34  ;;  %v1136_v9 = vsub.f32 %v2716_v50, %v1100_v47  ;;  %v1431_v17 = vor.u32 1.1754944e-38, %v1430_v27 }
 0x353   :  { %v2834_v49 = vpop.eup %2169  ;;  %1758 = vst [vmem:[%s2964_s3 + $0x48] sm:$0xff] %v1418_v44  ;;  %v1422_v45 = vmul.f32 %v2168_v31, %v1421_v52  ;;  %v1195_v42 = vmul.f32 1.442695, %v1136_v9 }
 0x354   :  { %1257 = vadd.xlane.f32.xlu1 %v2834_v49 }
 0x355   :  { %v1423_v48 = vadd.f32 %v2168_v31, %v1422_v45  ;;  %2171 = vpow2.f32 %v1195_v42 }
 0x357   :  { %v1427_v51 = vsel %vm1426_vm10, %v2168_v31, %v1423_v48 }
 0x358   :  { %v1432_v50 = vsel %vm1429_vm11, %v1431_v17, %v1427_v51  ;;  %v1102_v7 = vpop.xlane.xlu1 %1101 }
 0x359   :  { %v1433_v38 = vmul.f32 %v2708_v62, %v1432_v50  ;;  %v1137_v59 = vsub.f32 %v2720_v61, %v1102_v7 }
 0x35b   :  { %v2842_v0 = vpop.eup %2171  ;;  %1759 = vst [vmem:[%s2964_s3 + $0x50] sm:$0xff] %v1433_v38  ;;  %v1197_v1 = vmul.f32 1.442695, %v1137_v59 }
 0x35c   :  { %1259 = vadd.xlane.f32.xlu2 %v2842_v0 }
 0x35d   :  { %2173 = vpow2.f32 %v1197_v1 }
 0x360   :  { %v1104_v2 = vpop.xlane.xlu2 %1103 }
 0x361   :  { %v1138_v15 = vsub.f32 %v2725_v24, %v1104_v2 }
 0x363   :  { %v2849_v33 = vpop.eup %2173  ;;  %v1199_v10 = vmul.f32 1.442695, %v1138_v15 }
 0x364   :  { %1261 = vadd.xlane.f32.xlu0 %v2849_v33 }
 0x365   :  { %2175 = vpow2.f32 %v1199_v10 }
 0x368   :  { %v1230_v62 = vpop.xlane.xlu2 %1229  ;;  %v1106_v61 = vpop.xlane.xlu0 %1105 }
 0x369   :  { %2177 = vrcp.f32 %v1230_v62  ;;  %v1139_v11 = vsub.f32 %v2731_v58, %v1106_v61  ;;  %v1460_v20 = vand.u32 2147483648, %v1230_v62  ;;  %v1458_v8 = vand.u32 2147483647, %v1230_v62 }
 0x36a   :  { %vm1454_vm13 = vweird.f32 %v1230_v62 }
 0x36b   :  { %v2853_v60 = vpop.eup %2175  ;;  %v1201_v36 = vmul.f32 1.442695, %v1139_v11  ;;  %v1461_v40 = vor.u32 1.1754944e-38, %v1460_v20  ;;  %vm1459_vm15 = vcmp.eq.f32.partialorder %v1458_v8, 8.507059e+37 }
 0x36c   :  { %1263 = vadd.xlane.f32.xlu1 %v2853_v60 }
 0x36d   :  { %2179 = vpow2.f32 %v1201_v36 }
 0x36f   :  { %v2178_v57 = vpop.eup %2177 }
 0x370   :  { %v1450_v55 = vmul.f32 %v2178_v57, %v1230_v62  ;;  %v1108_v24 = vpop.xlane.xlu1 %1107  ;;  %v1232_v3 = vpop.xlane.xlu0 %1231  ;;  %vm1455_vm12 = vweird.f32 %v2178_v57 }
 0x371   :  { %v1140_v41 = vsub.f32 %v2742_v16, %v1108_v24  ;;  %v1236_v19 = vpop.xlane.xlu2 %1235  ;;  %2181 = vrcp.f32 %v1232_v3  ;;  %vm1456_vm14 = vmor %vm1454_vm13, %vm1455_vm12  ;;  %v1475_v27 = vand.u32 2147483648, %v1232_v3  ;;  %v1473_v42 = vand.u32 2147483647, %v1232_v3 }
 0x372   :  { %v1451_v21 = vsub.f32 1.0, %v1450_v55  ;;  %2183 = vrcp.f32 %v1236_v19  ;;  %v1505_v45 = vand.u32 2147483648, %v1236_v19  ;;  %vm1469_vm2 = vweird.f32 %v1232_v3 }
 0x373   :  { %v1203_v26 = vmul.f32 1.442695, %v1140_v41  ;;  %v2857_v30 = vpop.eup %2179  ;;  %vm1499_vm3 = vweird.f32 %v1236_v19  ;;  %v1476_v7 = vor.u32 1.1754944e-38, %v1475_v27  ;;  %vm1474_vm6 = vcmp.eq.f32.partialorder %v1473_v42, 8.507059e+37 }
 0x374   :  { %v1452_v58 = vmul.f32 %v2178_v57, %v1451_v21  ;;  %1265 = vadd.xlane.f32.xlu2 %v2857_v30  ;;  %v1506_v38 = vor.u32 1.1754944e-38, %v1505_v45 }
 0x375   :  { %2185 = vpow2.f32 %v1203_v26 }
 0x376   :  { %v1453_v22 = vadd.f32 %v2178_v57, %v1452_v58 }
 0x377   :  { %v2182_v53 = vpop.eup %2181 }
 0x378   :  { %v2184_v16 = vpop.eup %2183  ;;  %v1457_v5 = vsel %vm1456_vm14, %v2178_v57, %v1453_v22  ;;  %v1465_v31 = vmul.f32 %v2182_v53, %v1232_v3  ;;  %v2860_v23 = vpop.xlane.xlu1 %1227  ;;  %vm1470_vm0 = vweird.f32 %v2182_v53 }
 0x379   :  { %v2862_v28 = vpop.xlane.xlu0 %1237  ;;  %v1462_v34 = vsel %vm1459_vm15, %v1461_v40, %v1457_v5  ;;  %v1495_v4 = vmul.f32 %v2184_v16, %v1236_v19  ;;  %2187 = vrcp.f32 %v2860_v23  ;;  %vm1500_vm1 = vweird.f32 %v2184_v16  ;;  %vm1471_vm4 = vmor %vm1469_vm2, %vm1470_vm0 }
 0x37a   :  { %v1463_v47 = vmul.f32 %v2733_v54, %v1462_v34  ;;  %v1466_v44 = vsub.f32 1.0, %v1465_v31  ;;  %2189 = vrcp.f32 %v2862_v28  ;;  %v1503_v54 = vand.u32 2147483647, %v1236_v19  ;;  %vm1501_vm5 = vmor %vm1499_vm3, %vm1500_vm1 }
 0x37b   :  { %v2866_v52 = vpop.eup %2185  ;;  %v1496_v9 = vsub.f32 1.0, %v1495_v4  ;;  %v1445_v24 = vand.u32 2147483648, %v2860_v23  ;;  %v1443_v41 = vand.u32 2147483647, %v2860_v23  ;;  %vm1439_vm9 = vweird.f32 %v2860_v23 }
 0x37c   :  { %1761 = vst [vmem:[%s2964_s3 + $0x60] sm:$0xff] %v1463_v47  ;;  %v1467_v25 = vmul.f32 %v2182_v53, %v1466_v44  ;;  %1267 = vadd.xlane.f32.xlu0 %v2866_v52  ;;  %vm1504_vm7 = vcmp.eq.f32.partialorder %v1503_v54, 8.507059e+37  ;;  %v1518_v20 = vand.u32 2147483647, %v2862_v28  ;;  %vm1514_vm12 = vweird.f32 %v2862_v28 }
 0x37d   :  { %v1497_v48 = vmul.f32 %v2184_v16, %v1496_v9  ;;  %v1446_v58 = vor.u32 1.1754944e-38, %v1445_v24  ;;  %vm1444_vm13 = vcmp.eq.f32.partialorder %v1443_v41, 8.507059e+37 }
 0x37e   :  { %v1468_v17 = vadd.f32 %v2182_v53, %v1467_v25  ;;  %vm1519_vm15 = vcmp.eq.f32.partialorder %v1518_v20, 8.507059e+37 }
 0x37f   :  { %v2188_v51 = vpop.eup %2187  ;;  %v1498_v50 = vadd.f32 %v2184_v16, %v1497_v48 }
 0x380   :  { %v1472_v59 = vsel %vm1471_vm4, %v2182_v53, %v1468_v17  ;;  %v1435_v1 = vmul.f32 %v2188_v51, %v2860_v23  ;;  %v1234_v2 = vpop.xlane.xlu1 %1233  ;;  %v2190_v15 = vpop.eup %2189  ;;  %vm1440_vm8 = vweird.f32 %v2188_v51 }
 0x381   :  { %v1502_v10 = vsel %vm1501_vm5, %v2184_v16, %v1498_v50  ;;  %v1477_v62 = vsel %vm1474_vm6, %v1476_v7, %v1472_v59  ;;  %2191 = vrcp.f32 %v1234_v2  ;;  %v1510_v57 = vmul.f32 %v2190_v15, %v2862_v28  ;;  %vm1441_vm11 = vmor %vm1439_vm9, %vm1440_vm8 }
 0x382   :  { %v1507_v61 = vsel %vm1504_vm7, %v1506_v38, %v1502_v10  ;;  %v1478_v11 = vmul.f32 %v2744_v29, %v1477_v62  ;;  %v1436_v36 = vsub.f32 1.0, %v1435_v1  ;;  %v1520_v29 = vand.u32 2147483648, %v2862_v28 }
 0x383   :  { %v1508_v55 = vmul.f32 %v2739_v13, %v1507_v61  ;;  %v1511_v19 = vsub.f32 1.0, %v1510_v57  ;;  %vm1515_vm10 = vweird.f32 %v2190_v15  ;;  %v1490_v44 = vand.u32 2147483648, %v1234_v2 }
 0x384   :  { %1762 = vst [vmem:[%s2964_s3 + $0x68] sm:$0xff] %v1478_v11  ;;  %v1437_v3 = vmul.f32 %v2188_v51, %v1436_v36  ;;  %vm1516_vm14 = vmor %vm1514_vm12, %vm1515_vm10  ;;  %v1521_v31 = vor.u32 1.1754944e-38, %v1520_v29  ;;  %v1488_v27 = vand.u32 2147483647, %v1234_v2  ;;  %vm1484_vm1 = vweird.f32 %v1234_v2 }
 0x385   :  { %1764 = vst [vmem:[%s2964_s3 + $0x78] sm:$0xff] %v1508_v55  ;;  %v1512_v21 = vmul.f32 %v2190_v15, %v1511_v19  ;;  %v1491_v25 = vor.u32 1.1754944e-38, %v1490_v44 }
 0x386   :  { %v1438_v13 = vadd.f32 %v2188_v51, %v1437_v3  ;;  %vm1489_vm3 = vcmp.eq.f32.partialorder %v1488_v27, 8.507059e+37 }
 0x387   :  { %v2192_v26 = vpop.eup %2191  ;;  %v1242_v8 = vpop.xlane.xlu2 %1241  ;;  %v1513_v53 = vadd.f32 %v2190_v15, %v1512_v21 }
 0x388   :  { %v1442_v22 = vsel %vm1441_vm11, %v2188_v51, %v1438_v13  ;;  %v1480_v40 = vmul.f32 %v2192_v26, %v1234_v2  ;;  %v1240_v16 = vpop.xlane.xlu1 %1239  ;;  %2193 = vrcp.f32 %v1242_v8  ;;  %vm1485_vm0 = vweird.f32 %v2192_v26 }
 0x389   :  { %v1447_v5 = vsel %vm1444_vm13, %v1446_v58, %v1442_v22  ;;  %v1517_v34 = vsel %vm1516_vm14, %v2190_v15, %v1513_v53  ;;  %2195 = vrcp.f32 %v1240_v16  ;;  %vm1486_vm2 = vmor %vm1484_vm1, %vm1485_vm0  ;;  %v1548_v38 = vand.u32 2147483647, %v1242_v8 }
 0x38a   :  { %v1448_v23 = vmul.f32 %v2752_v14, %v1447_v5  ;;  %v1481_v4 = vsub.f32 1.0, %v1480_v40  ;;  %v1522_v47 = vsel %vm1519_vm15, %v1521_v31, %v1517_v34  ;;  %v1550_v59 = vand.u32 2147483648, %v1242_v8 }
 0x38b   :  { %v1523_v28 = vmul.f32 %v2750_v39, %v1522_v47  ;;  %vm1544_vm5 = vweird.f32 %v1242_v8  ;;  %v1535_v15 = vand.u32 2147483648, %v1240_v16  ;;  %v1533_v11 = vand.u32 2147483647, %v1240_v16 }
 0x38c   :  { %1760 = vst [vmem:[%s2964_s3 + $0x58] sm:$0xff] %v1448_v23  ;;  %v1482_v9 = vmul.f32 %v2192_v26, %v1481_v4  ;;  %vm1549_vm8 = vcmp.eq.f32.partialorder %v1548_v38, 8.507059e+37  ;;  %vm1529_vm9 = vweird.f32 %v1240_v16 }
 0x38d   :  { %1765 = vst [vmem:[%s2964_s3 + $0x80] sm:$0xff] %v1523_v28  ;;  %v1536_v41 = vor.u32 1.1754944e-38, %v1535_v15  ;;  %vm1534_vm11 = vcmp.eq.f32.partialorder %v1533_v11, 8.507059e+37 }
 0x38e   :  { %v1483_v14 = vadd.f32 %v2192_v26, %v1482_v9  ;;  %v2194_v45 = vpop.eup %2193 }
 0x38f   :  { %v1244_v42 = vpop.xlane.xlu0 %1243  ;;  %v1540_v54 = vmul.f32 %v2194_v45, %v1242_v8  ;;  %v2196_v17 = vpop.eup %2195  ;;  %vm1545_vm4 = vweird.f32 %v2194_v45 }
 0x390   :  { %v1487_v48 = vsel %vm1486_vm2, %v2192_v26, %v1483_v14  ;;  %2197 = vrcp.f32 %v1244_v42  ;;  %v1525_v7 = vmul.f32 %v2196_v17, %v1240_v16  ;;  %vm1530_vm6 = vweird.f32 %v2196_v17  ;;  %vm1546_vm7 = vmor %vm1544_vm5, %vm1545_vm4 }
 0x391   :  { %v1492_v51 = vsel %vm1489_vm3, %v1491_v25, %v1487_v48  ;;  %v1541_v50 = vsub.f32 1.0, %v1540_v54  ;;  %vm1531_vm10 = vmor %vm1529_vm9, %vm1530_vm6  ;;  %v1565_v21 = vand.u32 2147483648, %v1244_v42  ;;  %v1563_v58 = vand.u32 2147483647, %v1244_v42 }
 0x392   :  { %v1493_v39 = vmul.f32 %v2762_v46, %v1492_v51  ;;  %v1526_v2 = vsub.f32 1.0, %v1525_v7  ;;  %v1551_v46 = vor.u32 1.1754944e-38, %v1550_v59  ;;  %vm1559_vm13 = vweird.f32 %v1244_v42 }
 0x393   :  { %v1542_v1 = vmul.f32 %v2194_v45, %v1541_v50  ;;  %vm1564_vm15 = vcmp.eq.f32.partialorder %v1563_v58, 8.507059e+37 }
 0x394   :  { %1763 = vst [vmem:[%s2964_s3 + $0x70] sm:$0xff] %v1493_v39  ;;  %v1527_v61 = vmul.f32 %v2196_v17, %v1526_v2 }
 0x395   :  { %v1543_v62 = vadd.f32 %v2194_v45, %v1542_v1 }
 0x396   :  { %v2198_v10 = vpop.eup %2197  ;;  %v1528_v24 = vadd.f32 %v2196_v17, %v1527_v61 }
 0x397   :  { %v1555_v36 = vmul.f32 %v2198_v10, %v1244_v42  ;;  %v1246_v57 = vpop.xlane.xlu1 %1245  ;;  %v1547_v55 = vsel %vm1546_vm7, %v2194_v45, %v1543_v62  ;;  %vm1560_vm12 = vweird.f32 %v2198_v10 }
 0x398   :  { %2199 = vrcp.f32 %v1246_v57  ;;  %v1552_v3 = vsel %vm1549_vm8, %v1551_v46, %v1547_v55  ;;  %v1532_v13 = vsel %vm1531_vm10, %v2196_v17, %v1528_v24  ;;  %vm1561_vm14 = vmor %vm1559_vm13, %vm1560_vm12  ;;  %v1580_v4 = vand.u32 2147483648, %v1246_v57 }
 0x399   :  { %v1556_v19 = vsub.f32 1.0, %v1555_v36  ;;  %v1553_v29 = vmul.f32 %v2767_v56, %v1552_v3  ;;  %v1537_v20 = vsel %vm1534_vm11, %v1536_v41, %v1532_v13  ;;  %v1566_v56 = vor.u32 1.1754944e-38, %v1565_v21 }
 0x39a   :  { %v1538_v8 = vmul.f32 %v2772_v43, %v1537_v20  ;;  %v1578_v47 = vand.u32 2147483647, %v1246_v57  ;;  %vm1574_vm1 = vweird.f32 %v1246_v57  ;;  %v1581_v9 = vor.u32 1.1754944e-38, %v1580_v4 }
 0x39b   :  { %v1557_v26 = vmul.f32 %v2198_v10, %v1556_v19  ;;  %1767 = vst [vmem:[%s2964_s3 + $0x90] sm:$0xff] %v1553_v29 }
 0x39c   :  { %1766 = vst [vmem:[%s2964_s3 + $0x88] sm:$0xff] %v1538_v8  ;;  %vm1579_vm3 = vcmp.eq.f32.partialorder %v1578_v47, 8.507059e+37 }
 0x39d   :  { %v1558_v22 = vadd.f32 %v2198_v10, %v1557_v26 }
 0x39e   :  { %v2200_v53 = vpop.eup %2199 }
 0x39f   :  { %v1562_v40 = vsel %vm1561_vm14, %v2198_v10, %v1558_v22  ;;  %v1570_v16 = vmul.f32 %v2200_v53, %v1246_v57  ;;  %v1248_v5 = vpop.xlane.xlu2 %1247  ;;  %vm1575_vm0 = vweird.f32 %v2200_v53 }
 0x3a0   :  { %v1567_v31 = vsel %vm1564_vm15, %v1566_v56, %v1562_v40  ;;  %2201 = vrcp.f32 %v1248_v5  ;;  %vm1576_vm2 = vmor %vm1574_vm1, %vm1575_vm0  ;;  %v1595_v48 = vand.u32 2147483648, %v1248_v5  ;;  %v1593_v17 = vand.u32 2147483647, %v1248_v5 }
 0x3a1   :  { %v1568_v23 = vmul.f32 %v2778_v32, %v1567_v31  ;;  %v1571_v34 = vsub.f32 1.0, %v1570_v16  ;;  %vm1589_vm5 = vweird.f32 %v1248_v5 }
 0x3a2   :  { %v1596_v50 = vor.u32 1.1754944e-38, %v1595_v48  ;;  %vm1594_vm7 = vcmp.eq.f32.partialorder %v1593_v17, 8.507059e+37 }
 0x3a3   :  { %1768 = vst [vmem:[%s2964_s3 + $0x98] sm:$0xff] %v1568_v23  ;;  %v1572_v43 = vmul.f32 %v2200_v53, %v1571_v34 }
 0x3a5   :  { %v1573_v44 = vadd.f32 %v2200_v53, %v1572_v43 }
 0x3a6   :  { %v2202_v28 = vpop.eup %2201 }
 0x3a7   :  { %v1577_v27 = vsel %vm1576_vm2, %v2200_v53, %v1573_v44  ;;  %v1585_v14 = vmul.f32 %v2202_v28, %v1248_v5  ;;  %v1250_v45 = vpop.xlane.xlu0 %1249  ;;  %vm1590_vm4 = vweird.f32 %v2202_v28 }
 0x3a8   :  { %v1582_v25 = vsel %vm1579_vm3, %v1581_v9, %v1577_v27  ;;  %2203 = vrcp.f32 %v1250_v45  ;;  %vm1591_vm6 = vmor %vm1589_vm5, %vm1590_vm4  ;;  %v1610_v15 = vand.u32 2147483648, %v1250_v45  ;;  %v1608_v62 = vand.u32 2147483647, %v1250_v45 }
 0x3a9   :  { %v1583_v32 = vmul.f32 %v2786_v12, %v1582_v25  ;;  %v1586_v42 = vsub.f32 1.0, %v1585_v14  ;;  %vm1604_vm9 = vweird.f32 %v1250_v45 }
 0x3aa   :  { %v1611_v46 = vor.u32 1.1754944e-38, %v1610_v15  ;;  %vm1609_vm11 = vcmp.eq.f32.partialorder %v1608_v62, 8.507059e+37 }
 0x3ab   :  { %1769 = vst [vmem:[%s2964_s3 + $0xa0] sm:$0xff] %v1583_v32  ;;  %v1587_v54 = vmul.f32 %v2202_v28, %v1586_v42 }
 0x3ad   :  { %v1588_v51 = vadd.f32 %v2202_v28, %v1587_v54 }
 0x3ae   :  { %v2204_v39 = vpop.eup %2203 }
 0x3af   :  { %v1592_v7 = vsel %vm1591_vm6, %v2202_v28, %v1588_v51  ;;  %v1600_v38 = vmul.f32 %v2204_v39, %v1250_v45  ;;  %v1252_v59 = vpop.xlane.xlu1 %1251  ;;  %vm1605_vm8 = vweird.f32 %v2204_v39 }
 0x3b0   :  { %v1597_v1 = vsel %vm1594_vm7, %v1596_v50, %v1592_v7  ;;  %2205 = vrcp.f32 %v1252_v59  ;;  %vm1606_vm10 = vmor %vm1604_vm9, %vm1605_vm8  ;;  %v1625_v41 = vand.u32 2147483648, %v1252_v59  ;;  %v1623_v29 = vand.u32 2147483647, %v1252_v59 }
 0x3b1   :  { %v1598_v12 = vmul.f32 %v2794_v18, %v1597_v1  ;;  %v1601_v2 = vsub.f32 1.0, %v1600_v38  ;;  %vm1619_vm13 = vweird.f32 %v1252_v59 }
 0x3b2   :  { %v1626_v20 = vor.u32 1.1754944e-38, %v1625_v41  ;;  %vm1624_vm15 = vcmp.eq.f32.partialorder %v1623_v29, 8.507059e+37 }
 0x3b3   :  { %1770 = vst [vmem:[%s2964_s3 + $0xa8] sm:$0xff] %v1598_v12  ;;  %v1602_v10 = vmul.f32 %v2204_v39, %v1601_v2 }
 0x3b5   :  { %v1603_v61 = vadd.f32 %v2204_v39, %v1602_v10 }
 0x3b6   :  { %v2206_v11 = vpop.eup %2205 }
 0x3b7   :  { %v1607_v36 = vsel %vm1606_vm10, %v2204_v39, %v1603_v61  ;;  %v1615_v57 = vmul.f32 %v2206_v11, %v1252_v59  ;;  %v1254_v55 = vpop.xlane.xlu2 %1253  ;;  %vm1620_vm12 = vweird.f32 %v2206_v11 }
 0x3b8   :  { %v1612_v24 = vsel %vm1609_vm11, %v1611_v46, %v1607_v36  ;;  %2207 = vrcp.f32 %v1254_v55  ;;  %vm1621_vm14 = vmor %vm1619_vm13, %vm1620_vm12  ;;  %v1640_v56 = vand.u32 2147483648, %v1254_v55  ;;  %v1638_v16 = vand.u32 2147483647, %v1254_v55 }
 0x3b9   :  { %v1613_v18 = vmul.f32 %v2802_v37, %v1612_v24  ;;  %v1616_v3 = vsub.f32 1.0, %v1615_v57  ;;  %vm1634_vm1 = vweird.f32 %v1254_v55 }
 0x3ba   :  { %v1641_v23 = vor.u32 1.1754944e-38, %v1640_v56  ;;  %vm1639_vm3 = vcmp.eq.f32.partialorder %v1638_v16, 8.507059e+37 }
 0x3bb   :  { %1771 = vst [vmem:[%s2964_s3 + $0xb0] sm:$0xff] %v1613_v18  ;;  %v1617_v19 = vmul.f32 %v2206_v11, %v1616_v3 }
 0x3bd   :  { %v1618_v13 = vadd.f32 %v2206_v11, %v1617_v19 }
 0x3be   :  { %v2208_v21 = vpop.eup %2207 }
 0x3bf   :  { %v1622_v26 = vsel %vm1621_vm14, %v2206_v11, %v1618_v13  ;;  %v1630_v58 = vmul.f32 %v2208_v21, %v1254_v55  ;;  %v1256_v8 = vpop.xlane.xlu0 %1255  ;;  %vm1635_vm0 = vweird.f32 %v2208_v21 }
 0x3c0   :  { %v1627_v22 = vsel %vm1624_vm15, %v1626_v20, %v1622_v26  ;;  %2209 = vrcp.f32 %v1256_v8  ;;  %vm1636_vm2 = vmor %vm1634_vm1, %vm1635_vm0  ;;  %v1655_v28 = vand.u32 2147483648, %v1256_v8  ;;  %v1653_v27 = vand.u32 2147483647, %v1256_v8 }
 0x3c1   :  { %v1628_v37 = vmul.f32 %v2810_v63, %v1627_v22  ;;  %v1631_v53 = vsub.f32 1.0, %v1630_v58  ;;  %vm1649_vm5 = vweird.f32 %v1256_v8 }
 0x3c2   :  { %v1656_v25 = vor.u32 1.1754944e-38, %v1655_v28  ;;  %vm1654_vm7 = vcmp.eq.f32.partialorder %v1653_v27, 8.507059e+37 }
 0x3c3   :  { %1772 = vst [vmem:[%s2964_s3 + $0xb8] sm:$0xff] %v1628_v37  ;;  %v1632_v40 = vmul.f32 %v2208_v21, %v1631_v53 }
 0x3c5   :  { %v1633_v5 = vadd.f32 %v2208_v21, %v1632_v40 }
 0x3c6   :  { %v2210_v31 = vpop.eup %2209 }
 0x3c7   :  { %v1637_v34 = vsel %vm1636_vm2, %v2208_v21, %v1633_v5  ;;  %v1645_v4 = vmul.f32 %v2210_v31, %v1256_v8  ;;  %v1258_v43 = vpop.xlane.xlu1 %1257  ;;  %vm1650_vm4 = vweird.f32 %v2210_v31 }
 0x3c8   :  { %v1642_v47 = vsel %vm1639_vm3, %v1641_v23, %v1637_v34  ;;  %2211 = vrcp.f32 %v1258_v43  ;;  %vm1651_vm6 = vmor %vm1649_vm5, %vm1650_vm4  ;;  %v1670_v51 = vand.u32 2147483648, %v1258_v43  ;;  %v1668_v50 = vand.u32 2147483647, %v1258_v43 }
 0x3c9   :  { %v1643_v63 = vmul.f32 %v2818_v6, %v1642_v47  ;;  %v1646_v44 = vsub.f32 1.0, %v1645_v4  ;;  %vm1664_vm9 = vweird.f32 %v1258_v43 }
 0x3ca   :  { %v1671_v59 = vor.u32 1.1754944e-38, %v1670_v51  ;;  %vm1669_vm11 = vcmp.eq.f32.partialorder %v1668_v50, 8.507059e+37 }
 0x3cb   :  { %1773 = vst [vmem:[%s2964_s3 + $0xc0] sm:$0xff] %v1643_v63  ;;  %v1647_v9 = vmul.f32 %v2210_v31, %v1646_v44 }
 0x3cd   :  { %v1648_v14 = vadd.f32 %v2210_v31, %v1647_v9 }
 0x3ce   :  { %v2212_v45 = vpop.eup %2211 }
 0x3cf   :  { %v1652_v32 = vsel %vm1651_vm6, %v2210_v31, %v1648_v14  ;;  %v1660_v42 = vmul.f32 %v2212_v45, %v1258_v43  ;;  %v1260_v48 = vpop.xlane.xlu2 %1259  ;;  %vm1665_vm8 = vweird.f32 %v2212_v45 }
 0x3d0   :  { %v1657_v54 = vsel %vm1654_vm7, %v1656_v25, %v1652_v32  ;;  %2213 = vrcp.f32 %v1260_v48  ;;  %vm1666_vm10 = vmor %vm1664_vm9, %vm1665_vm8  ;;  %v1685_v62 = vand.u32 2147483648, %v1260_v48  ;;  %v1683_v11 = vand.u32 2147483647, %v1260_v48 }
 0x3d1   :  { %v1658_v6 = vmul.f32 %v2826_v35, %v1657_v54  ;;  %v1661_v17 = vsub.f32 1.0, %v1660_v42  ;;  %vm1679_vm13 = vweird.f32 %v1260_v48 }
 0x3d2   :  { %v1686_v57 = vor.u32 1.1754944e-38, %v1685_v62  ;;  %vm1684_vm15 = vcmp.eq.f32.partialorder %v1683_v11, 8.507059e+37 }
 0x3d3   :  { %1774 = vst [vmem:[%s2964_s3 + $0xc8] sm:$0xff] %v1658_v6  ;;  %v1662_v39 = vmul.f32 %v2212_v45, %v1661_v17 }
 0x3d5   :  { %v1663_v7 = vadd.f32 %v2212_v45, %v1662_v39 }
 0x3d6   :  { %v2214_v38 = vpop.eup %2213 }
 0x3d7   :  { %v1667_v1 = vsel %vm1666_vm10, %v2212_v45, %v1663_v7  ;;  %v1675_v12 = vmul.f32 %v2214_v38, %v1260_v48  ;;  %v1262_v2 = vpop.xlane.xlu0 %1261  ;;  %vm1680_vm12 = vweird.f32 %v2214_v38 }
 0x3d8   :  { %v1672_v15 = vsel %vm1669_vm11, %v1671_v59, %v1667_v1  ;;  %2215 = vrcp.f32 %v1262_v2  ;;  %vm1681_vm14 = vmor %vm1679_vm13, %vm1680_vm12  ;;  %v1700_v19 = vand.u32 2147483648, %v1262_v2  ;;  %v1698_v13 = vand.u32 2147483647, %v1262_v2 }
 0x3d9   :  { %v1673_v35 = vmul.f32 %v2834_v49, %v1672_v15  ;;  %v1676_v10 = vsub.f32 1.0, %v1675_v12  ;;  %vm1694_vm1 = vweird.f32 %v1262_v2 }
 0x3da   :  { %v1701_v26 = vor.u32 1.1754944e-38, %v1700_v19  ;;  %vm1699_vm3 = vcmp.eq.f32.partialorder %v1698_v13, 8.507059e+37 }
 0x3db   :  { %1775 = vst [vmem:[%s2964_s3 + $0xd0] sm:$0xff] %v1673_v35  ;;  %v1677_v61 = vmul.f32 %v2214_v38, %v1676_v10 }
 0x3dd   :  { %v1678_v46 = vadd.f32 %v2214_v38, %v1677_v61 }
 0x3de   :  { %v2216_v36 = vpop.eup %2215 }
 0x3df   :  { %v1682_v55 = vsel %vm1681_vm14, %v2214_v38, %v1678_v46  ;;  %v1690_v24 = vmul.f32 %v2216_v36, %v1262_v2  ;;  %v1264_v18 = vpop.xlane.xlu1 %1263  ;;  %vm1695_vm0 = vweird.f32 %v2216_v36 }
 0x3e0   :  { %v1687_v3 = vsel %vm1684_vm15, %v1686_v57, %v1682_v55  ;;  %2217 = vrcp.f32 %v1264_v18  ;;  %vm1696_vm2 = vmor %vm1694_vm1, %vm1695_vm0  ;;  %v1715_v56 = vand.u32 2147483648, %v1264_v18  ;;  %v1713_v16 = vand.u32 2147483647, %v1264_v18 }
 0x3e1   :  { %v1688_v49 = vmul.f32 %v2842_v0, %v1687_v3  ;;  %v1691_v41 = vsub.f32 1.0, %v1690_v24  ;;  %vm1709_vm5 = vweird.f32 %v1264_v18 }
 0x3e2   :  { %v1716_v31 = vor.u32 1.1754944e-38, %v1715_v56  ;;  %vm1714_vm7 = vcmp.eq.f32.partialorder %v1713_v16, 8.507059e+37 }
 0x3e3   :  { %1776 = vst [vmem:[%s2964_s3 + $0xd8] sm:$0xff] %v1688_v49  ;;  %v1692_v29 = vmul.f32 %v2216_v36, %v1691_v41 }
 0x3e5   :  { %v1693_v21 = vadd.f32 %v2216_v36, %v1692_v29 }
 0x3e6   :  { %v2218_v20 = vpop.eup %2217 }
 0x3e7   :  { %v1697_v58 = vsel %vm1696_vm2, %v2216_v36, %v1693_v21  ;;  %v1705_v8 = vmul.f32 %v2218_v20, %v1264_v18  ;;  %v1266_v37 = vpop.xlane.xlu2 %1265  ;;  %vm1710_vm4 = vweird.f32 %v2218_v20 }
 0x3e8   :  { %v1702_v22 = vsel %vm1699_vm3, %v1701_v26, %v1697_v58  ;;  %2219 = vrcp.f32 %v1266_v37  ;;  %vm1711_vm6 = vmor %vm1709_vm5, %vm1710_vm4  ;;  %v1730_v44 = vand.u32 2147483648, %v1266_v37  ;;  %v1728_v9 = vand.u32 2147483647, %v1266_v37 }
 0x3e9   :  { %v1703_v0 = vmul.f32 %v2849_v33, %v1702_v22  ;;  %v1706_v53 = vsub.f32 1.0, %v1705_v8  ;;  %vm1724_vm9 = vweird.f32 %v1266_v37 }
 0x3ea   :  { %v1731_v45 = vor.u32 1.1754944e-38, %v1730_v44  ;;  %vm1729_vm11 = vcmp.eq.f32.partialorder %v1728_v9, 8.507059e+37 }
 0x3eb   :  { %1777 = vst [vmem:[%s2964_s3 + $0xe0] sm:$0xff] %v1703_v0  ;;  %v1707_v40 = vmul.f32 %v2218_v20, %v1706_v53 }
 0x3ed   :  { %v1708_v5 = vadd.f32 %v2218_v20, %v1707_v40 }
 0x3ee   :  { %v2220_v23 = vpop.eup %2219 }
 0x3ef   :  { %v1712_v34 = vsel %vm1711_vm6, %v2218_v20, %v1708_v5  ;;  %v1268_v4 = vpop.xlane.xlu0 %1267  ;;  %v1720_v33 = vmul.f32 %v2220_v23, %v1266_v37  ;;  %vm1725_vm8 = vweird.f32 %v2220_v23 }
 0x3f0   :  { %v1717_v43 = vsel %vm1714_vm7, %v1716_v31, %v1712_v34  ;;  %2221 = vrcp.f32 %v1268_v4  ;;  %vm1726_vm10 = vmor %vm1724_vm9, %vm1725_vm8  ;;  %v1745_v54 = vand.u32 2147483648, %v1268_v4  ;;  %v1743_v17 = vand.u32 2147483647, %v1268_v4 }
 0x3f1   :  { %v1718_v47 = vmul.f32 %v2853_v60, %v1717_v43  ;;  %v1721_v63 = vsub.f32 1.0, %v1720_v33  ;;  %vm1739_vm13 = vweird.f32 %v1268_v4 }
 0x3f2   :  { %v1746_v39 = vor.u32 1.1754944e-38, %v1745_v54  ;;  %vm1744_vm15 = vcmp.eq.f32.partialorder %v1743_v17, 8.507059e+37 }
 0x3f3   :  { %1778 = vst [vmem:[%s2964_s3 + $0xe8] sm:$0xff] %v1718_v47  ;;  %v1722_v28 = vmul.f32 %v2220_v23, %v1721_v63 }
 0x3f5   :  { %v1723_v14 = vadd.f32 %v2220_v23, %v1722_v28 }
 0x3f6   :  { %v2222_v27 = vpop.eup %2221 }
 0x3f7   :  { %v1735_v25 = vmul.f32 %v2222_v27, %v1268_v4  ;;  %v1727_v32 = vsel %vm1726_vm10, %v2220_v23, %v1723_v14  ;;  %vm1740_vm12 = vweird.f32 %v2222_v27 }
 0x3f8   :  { %v1732_v42 = vsel %vm1729_vm11, %v1731_v45, %v1727_v32  ;;  %vm1741_vm14 = vmor %vm1739_vm13, %vm1740_vm12 }
 0x3f9   :  { %v1736_v48 = vsub.f32 1.0, %v1735_v25  ;;  %v1733_v60 = vmul.f32 %v2857_v30, %v1732_v42 }
 0x3fb   :  { %v1737_v6 = vmul.f32 %v2222_v27, %v1736_v48  ;;  %1779 = vst [vmem:[%s2964_s3 + $0xf0] sm:$0xff] %v1733_v60 }
 0x3fd   :  { %v1738_v51 = vadd.f32 %v2222_v27, %v1737_v6 }
 0x3ff   :  { %v1742_v50 = vsel %vm1741_vm14, %v2222_v27, %v1738_v51 }
 0x400   :  { %v1747_v7 = vsel %vm1744_vm15, %v1746_v39, %v1742_v50 }
 0x401   :  { %v1748_v38 = vmul.f32 %v2866_v52, %v1747_v7 }
 0x403   :  { %1780 = vst [vmem:[%s2964_s3 + $0xf8] sm:$0xff] %v1748_v38 }
 0x404   :  { %1785 = vsyncpa [#allocation3], 1 }

</bundles_post_ra>
